<compile_context>
chip_gen: v7x
topology: tpu7x:2x2x1
jax: 0.10.0
libtpu: 0.0.40
codegen_flags: <defaults>
</compile_context>

<pallas_src>
import math
from functools import partial

import jax
import jax.numpy as jnp
from jax import lax
from jax.experimental import pallas as pl
from jax.experimental.pallas import tpu as pltpu


COMPUTE_DTYPE = jnp.bfloat16           # MXU-native matmul dtype

# GEMM / attention tile targets.
_TM, _TN, _TK = 1024, 1024, 512        # generic GEMM
_TM_LN = 512                           # LN-fused GEMM (full-D output block)
_TATT = 256                            # attention q/kv row tiles (tq == tkv)


def _pick_vmem_limit():
    """~75% of physical VMEM, capped at 100 MiB; conservative fallback."""
    try:
        cap = int(pltpu.get_tpu_info().vmem_capacity_bytes)
        return max(32 * 1024 * 1024, min((cap * 3) // 4, 100 * 1024 * 1024))
    except Exception:
        return 48 * 1024 * 1024


_VMEM_LIMIT = _pick_vmem_limit()


def _tile(dim: int, target: int, align: int) -> int:
    """Largest multiple of `align` that divides `dim` and is <= target, else full dim."""
    if dim <= target:
        return dim
    t = (target // align) * align
    while t >= align:
        if dim % t == 0:
            return t
        t -= align
    return dim


def _gelu_exact(y):
    # PyTorch activation='gelu' is the exact (erf) GELU.
    return 0.5 * y * (1.0 + lax.erf(y * (1.0 / math.sqrt(2.0))))


# ----------------------------- Pallas kernels ------------------------------

def _mm_kernel(x_ref, w_ref, b_ref, o_ref, acc_ref, *, activation):
    """Tiled o = act(x @ w + b); grid (M/tm, N/tn, K/tk), f32 accumulator scratch."""
    k = pl.program_id(2)

    @pl.when(k == 0)
    def _():
        acc_ref[...] = jnp.zeros_like(acc_ref)

    acc_ref[...] += jnp.dot(x_ref[...], w_ref[...],
                            preferred_element_type=jnp.float32)

    @pl.when(k == pl.num_programs(2) - 1)
    def _():
        y = acc_ref[...] + b_ref[...].astype(jnp.float32)
        if activation == "gelu":
            y = _gelu_exact(y)
        o_ref[...] = y.astype(o_ref.dtype)


def _mm_kernel_accout(x_ref, w_ref, b_ref, o_ref, *, activation):
    """Same as _mm_kernel but accumulates directly into the f32 output block
    (which is resident across k, since its index map ignores k)."""
    k = pl.program_id(2)

    @pl.when(k == 0)
    def _():
        o_ref[...] = jnp.zeros_like(o_ref)

    o_ref[...] += jnp.dot(x_ref[...], w_ref[...],
                          preferred_element_type=jnp.float32)

    @pl.when(k == pl.num_programs(2) - 1)
    def _():
        y = o_ref[...] + b_ref[...].astype(jnp.float32)
        if activation == "gelu":
            y = _gelu_exact(y)
        o_ref[...] = y


def _mm_add_ln_kernel(x_ref, w_ref, b_ref, res_ref, g_ref, bb_ref, o_ref,
                      acc_ref, *, eps):
    """Tiled o = LayerNorm(res + x @ w + b) * gamma + beta; grid (M/tm, K/tk)."""
    k = pl.program_id(1)

    @pl.when(k == 0)
    def _():
        acc_ref[...] = jnp.zeros_like(acc_ref)

    acc_ref[...] += jnp.dot(x_ref[...], w_ref[...],
                            preferred_element_type=jnp.float32)

    @pl.when(k == pl.num_programs(1) - 1)
    def _():
        h = (acc_ref[...] + b_ref[...].astype(jnp.float32)
             + res_ref[...].astype(jnp.float32))
        mean = jnp.mean(h, axis=-1, keepdims=True)
        var = jnp.mean(jnp.square(h - mean), axis=-1, keepdims=True)
        n = (h - mean) * lax.rsqrt(var + eps)
        o_ref[...] = (n * g_ref[...].astype(jnp.float32)
                      + bb_ref[...].astype(jnp.float32)).astype(o_ref.dtype)


def _flash_attn_kernel(q_ref, k_ref, v_ref, o_ref, m_ref, l_ref, acc_ref,
                       *, n_heads, dh, scale, is_causal):
    """Flash attention over one (batch, q-block); kv streamed on the last grid axis.

    Blocks are (tq, D) lane-dense; heads are processed as static lane slices of
    width dh, with per-head online-softmax state in (tq, H) / (tq, D) scratches.
    """
    qi = pl.program_id(1)
    ki = pl.program_id(2)
    nk = pl.num_programs(2)
    tq = q_ref.shape[1]
    tkv = k_ref.shape[1]

    @pl.when(ki == 0)
    def _():
        m_ref[...] = jnp.full(m_ref.shape, -jnp.inf, dtype=m_ref.dtype)
        l_ref[...] = jnp.zeros(l_ref.shape, dtype=l_ref.dtype)
        acc_ref[...] = jnp.zeros(acc_ref.shape, dtype=acc_ref.dtype)

    def body():
        q = q_ref[0] * scale                    # (tq, D); scale folded into q once
        k = k_ref[0]                            # (tkv, D)
        v = v_ref[0]                            # (tkv, D)
        if is_causal:
            row = qi * tq + lax.broadcasted_iota(jnp.int32, (tq, tkv), 0)
            col = ki * tkv + lax.broadcasted_iota(jnp.int32, (tq, tkv), 1)
            keep = col <= row
        for h in range(n_heads):                # static unroll; clean 2-D matmuls
            sl = slice(h * dh, (h + 1) * dh)
            s = lax.dot_general(q[:, sl], k[:, sl], (((1,), (1,)), ((), ())),
                                preferred_element_type=jnp.float32)  # (tq, tkv)
            if is_causal:
                s = jnp.where(keep, s, jnp.float32(-1e30))
            m_prev = m_ref[:, h:h + 1]                                # (tq, 1)
            m_new = jnp.maximum(m_prev, jnp.max(s, axis=-1, keepdims=True))
            alpha = jnp.exp(m_prev - m_new)
            p = jnp.exp(s - m_new)                                    # (tq, tkv)
            l_ref[:, h:h + 1] = alpha * l_ref[:, h:h + 1] + jnp.sum(
                p, axis=-1, keepdims=True)
            acc_ref[:, sl] = alpha * acc_ref[:, sl] + jnp.dot(
                p.astype(v.dtype), v[:, sl], preferred_element_type=jnp.float32)
            m_ref[:, h:h + 1] = m_new

    if is_causal:
        # Skip kv blocks that lie entirely above the causal diagonal.
        # (tq == tkv is enforced by the wrapper, so every processed block has
        #  at least one unmasked key per query row -> no all-masked rows.)
        @pl.when(ki * tkv <= qi * tq + (tq - 1))
        def _():
            body()
    else:
        body()

    @pl.when(ki == nk - 1)
    def _():
        for h in range(n_heads):
            sl = slice(h * dh, (h + 1) * dh)
            inv_l = pl.reciprocal(l_ref[:, h:h + 1], approx=True)     # EUP
            o_ref[0, :, sl] = (acc_ref[:, sl] * inv_l).astype(o_ref.dtype)


# ------------------------------ kernel wrappers -----------------------------

def matmul_bias(x, w, b, activation=None, out_dtype=None):
    """x:[M,K] bf16, w:[K,N] bf16 (pre-transposed), b:[N] f32 -> [M,N]."""
    M, K = x.shape
    N = w.shape[1]
    out_dtype = out_dtype if out_dtype is not None else x.dtype
    tm, tn, tk = _tile(M, _TM, 8), _tile(N, _TN, 128), _tile(K, _TK, 128)
    acc_in_out = (jnp.result_type(out_dtype) == jnp.float32)
    if acc_in_out:
        kernel = partial(_mm_kernel_accout, activation=activation)
        scratch = []
    else:
        kernel = partial(_mm_kernel, activation=activation)
        scratch = [pltpu.VMEM((tm, tn), jnp.float32)]
    return pl.pallas_call(
        kernel,
        out_shape=jax.ShapeDtypeStruct((M, N), out_dtype),
        grid=(M // tm, N // tn, K // tk),
        in_specs=[pl.BlockSpec((tm, tk), lambda i, j, k: (i, k)),
                  pl.BlockSpec((tk, tn), lambda i, j, k: (k, j)),
                  pl.BlockSpec((1, tn), lambda i, j, k: (0, j))],
        out_specs=pl.BlockSpec((tm, tn), lambda i, j, k: (i, j)),
        scratch_shapes=scratch,
        compiler_params=pltpu.CompilerParams(
            dimension_semantics=("parallel", "parallel", "arbitrary"),
            vmem_limit_bytes=_VMEM_LIMIT),
    )(x, w, b.reshape(1, N))


def matmul_bias_add_ln(x, w, b, res, gamma, beta, eps=1e-5, out_dtype=None):
    """o = LN(res + x @ w + b) * gamma + beta, LN over the full N (=D) axis."""
    M, K = x.shape
    N = w.shape[1]
    out_dtype = out_dtype if out_dtype is not None else res.dtype
    tm, tk = _tile(M, _TM_LN, 8), _tile(K, _TK, 128)
    return pl.pallas_call(
        partial(_mm_add_ln_kernel, eps=eps),
        out_shape=jax.ShapeDtypeStruct((M, N), out_dtype),
        grid=(M // tm, K // tk),
        in_specs=[pl.BlockSpec((tm, tk), lambda i, k: (i, k)),
                  pl.BlockSpec((tk, N), lambda i, k: (k, 0)),
                  pl.BlockSpec((1, N), lambda i, k: (0, 0)),
                  pl.BlockSpec((tm, N), lambda i, k: (i, 0)),
                  pl.BlockSpec((1, N), lambda i, k: (0, 0)),
                  pl.BlockSpec((1, N), lambda i, k: (0, 0))],
        out_specs=pl.BlockSpec((tm, N), lambda i, k: (i, 0)),
        scratch_shapes=[pltpu.VMEM((tm, N), jnp.float32)],
        compiler_params=pltpu.CompilerParams(
            dimension_semantics=("parallel", "arbitrary"),
            vmem_limit_bytes=_VMEM_LIMIT),
    )(x, w, b.reshape(1, N), res, gamma.reshape(1, N), beta.reshape(1, N))


def flash_attention(q, k, v, *, n_heads, is_causal=True):
    """q/k/v: [B, S, D] (contiguous, lane-dense) -> [B, S, D] (lane-dense)."""
    B, S, D = q.shape
    H = n_heads
    dh = D // H
    t = _tile(S, _TATT, 8)                    # tq == tkv (required by causal skip)
    kernel = partial(_flash_attn_kernel, n_heads=H, dh=dh,
                     scale=1.0 / math.sqrt(dh), is_causal=is_causal)
    row_spec_q = pl.BlockSpec((1, t, D), lambda b, qi, ki: (b, qi, 0))
    row_spec_kv = pl.BlockSpec((1, t, D), lambda b, qi, ki: (b, ki, 0))
    return pl.pallas_call(
        kernel,
        out_shape=jax.ShapeDtypeStruct((B, S, D), q.dtype),
        grid=(B, S // t, S // t),
        in_specs=[row_spec_q, row_spec_kv, row_spec_kv],
        out_specs=pl.BlockSpec((1, t, D), lambda b, qi, ki: (b, qi, 0)),
        scratch_shapes=[pltpu.VMEM((t, H), jnp.float32),    # m (running max)
                        pltpu.VMEM((t, H), jnp.float32),    # l (running denom)
                        pltpu.VMEM((t, D), jnp.float32)],   # acc (unnormalized out)
        compiler_params=pltpu.CompilerParams(
            dimension_semantics=("parallel", "parallel", "arbitrary"),
            vmem_limit_bytes=_VMEM_LIMIT),
    )(q, k, v)


# ------------------------------ model (glue) --------------------------------

def sinusoidal_pe(S, D, dtype=jnp.float32):
    pos = jnp.arange(S, dtype=jnp.float32)[:, None]
    i = jnp.arange(0, D, 2, dtype=jnp.float32)
    div = jnp.exp(-math.log(10000.0) * i / D)
    pe = jnp.zeros((S, D), jnp.float32)
    pe = pe.at[:, 0::2].set(jnp.sin(pos * div))
    pe = pe.at[:, 1::2].set(jnp.cos(pos * div))
    return pe.astype(dtype)


def encoder_layer(x2d, p, B, S, H, dh, is_causal):
    """Post-norm (norm_first=False) TransformerEncoderLayer, exact-erf GELU."""
    D = H * dh
    q = matmul_bias(x2d, p["q_w"], p["q_b"]).reshape(B, S, D)
    k = matmul_bias(x2d, p["k_w"], p["k_b"]).reshape(B, S, D)
    v = matmul_bias(x2d, p["v_w"], p["v_b"]).reshape(B, S, D)
    o = flash_attention(q, k, v, n_heads=H, is_causal=is_causal)    # [B, S, D]
    o2d = o.reshape(B * S, D)                                       # free reshape
    x2d = matmul_bias_add_ln(o2d, p["out_proj_w"], p["out_proj_b"],
                             x2d, p["ln1_g"], p["ln1_b"])           # norm1(x + sa)
    h = matmul_bias(x2d, p["ff1_w"], p["ff1_b"], activation="gelu")
    x2d = matmul_bias_add_ln(h, p["ff2_w"], p["ff2_b"],
                             x2d, p["ln2_g"], p["ln2_b"])           # norm2(x + ff)
    return x2d


def model_forward(params, src, *, n_heads, is_causal=True):
    """src: int32 [B, S] -> logits [B, vocab, S]."""
    # TODO(synk): arbitrary attn masks / key-padding masks not implemented;
    # only mask=None, padding_mask=None with the is_causal flag is supported.
    B, S = src.shape
    D = params["embed"].shape[1]
    H = n_heads
    dh = D // H
    x = jnp.take(params["embed"], src, axis=0)                  # [B, S, D] (row 0 = padding = 0)
    x = x + sinusoidal_pe(S, D, jnp.float32)[None]               # dropout = identity (inference)
    x = x.astype(COMPUTE_DTYPE).reshape(B * S, D)
    for p in params["layers"]:
        x = encoder_layer(x, p, B, S, H, dh, is_causal)
    # Final projection accumulates directly into its f32 output (lane-dense [B*S, vocab]);
    # the [B,S,V] -> [B,V,S] transpose stays in XLA.
    logits = matmul_bias(x, params["fin_w"], params["fin_b"], out_dtype=jnp.float32)
    logits = logits.reshape(B, S, -1)
    return jnp.swapaxes(logits, -1, -2)                          # [B, vocab, S]


# --------------------------- parameter construction -------------------------

def init_params(key, vocab, d, n_layers, ff_factor, w_dtype=COMPUTE_DTYPE):
    """Weights pre-transposed ([in, out]) in bf16; biases / LN params in f32."""
    d_ff = ff_factor * d
    keys = jax.random.split(key, 3 + n_layers)
    w = lambda k, shape: (0.02 * jax.random.normal(k, shape, jnp.float32)).astype(w_dtype)
    bias = lambda k, shape: 0.01 * jax.random.normal(k, shape, jnp.float32)

    embed = (0.02 * jax.random.normal(keys[0], (vocab, d), jnp.float32)).at[0].set(0.0)
    layers = []
    for li in range(n_layers):
        lk = jax.random.split(keys[3 + li], 12)
        layers.append(dict(
            q_w=w(lk[0], (d, d)),        q_b=bias(lk[1], (d,)),
            k_w=w(lk[2], (d, d)),        k_b=bias(lk[3], (d,)),
            v_w=w(lk[4], (d, d)),        v_b=bias(lk[5], (d,)),
            out_proj_w=w(lk[6], (d, d)), out_proj_b=bias(lk[7], (d,)),
            ff1_w=w(lk[8], (d, d_ff)),   ff1_b=bias(lk[9], (d_ff,)),
            ff2_w=w(lk[10], (d_ff, d)),  ff2_b=bias(lk[11], (d,)),
            ln1_g=jnp.ones((d,), jnp.float32), ln1_b=jnp.zeros((d,), jnp.float32),
            ln2_g=jnp.ones((d,), jnp.float32), ln2_b=jnp.zeros((d,), jnp.float32),
        ))
    fin_w = w(keys[1], (d, vocab))
    fin_b = bias(keys[2], (vocab,))
    return dict(embed=embed, layers=layers, fin_w=fin_w, fin_b=fin_b)


# ------------------------------- pure-JAX ref --------------------------------

def _ln_ref(x, g, b, eps=1e-5):
    m = x.mean(-1, keepdims=True)
    v = ((x - m) ** 2).mean(-1, keepdims=True)
    return (x - m) * lax.rsqrt(v + eps) * g + b


def reference_forward(params, src, n_heads):
    f32 = lambda a: a.astype(jnp.float32)
    x = f32(params["embed"])[src]
    B, S, D = x.shape
    x = x + sinusoidal_pe(S, D)[None]
    H, dh = n_heads, D // n_heads
    for p in params["layers"]:
        q = x @ f32(p["q_w"]) + p["q_b"]
        k = x @ f32(p["k_w"]) + p["k_b"]
        v = x @ f32(p["v_w"]) + p["v_b"]
        heads = lambda t: t.reshape(B, S, H, dh).transpose(0, 2, 1, 3)
        qh, kh, vh = heads(q), heads(k), heads(v)
        s = jnp.einsum("bhqd,bhkd->bhqk", qh, kh) / math.sqrt(dh)
        causal = jnp.tril(jnp.ones((S, S), bool))
        s = jnp.where(causal, s, -1e30)
        a = jax.nn.softmax(s, axis=-1)
        o = jnp.einsum("bhqk,bhkd->bhqd", a, vh).transpose(0, 2, 1, 3).reshape(B, S, D)
        o = o @ f32(p["out_proj_w"]) + p["out_proj_b"]
        x = _ln_ref(x + o, p["ln1_g"], p["ln1_b"])
        h = x @ f32(p["ff1_w"]) + p["ff1_b"]
        h = 0.5 * h * (1.0 + lax.erf(h / math.sqrt(2.0)))
        h = h @ f32(p["ff2_w"]) + p["ff2_b"]
        x = _ln_ref(x + h, p["ln2_g"], p["ln2_b"])
    logits = x @ f32(params["fin_w"]) + params["fin_b"]
    return jnp.swapaxes(logits, -1, -2)


# ---------------------------------- main -------------------------------------

if __name__ == "__main__":
    B, S = 2, 8
    mod_dim, vocab, n_heads, n_layers, ff_factor = 32, 64, 4, 2, 4

    key = jax.random.PRNGKey(0)
    pkey, skey = jax.random.split(key)
    params = init_params(pkey, vocab, mod_dim, n_layers, ff_factor)
    src = jax.random.randint(skey, (B, S), 0, vocab, dtype=jnp.int32)

    fwd = jax.jit(partial(model_forward, n_heads=n_heads, is_causal=True))
    out = fwd(params, src)
    jax.block_until_ready(out)

    ref = reference_forward(params, src, n_heads)
    assert out.shape == (B, vocab, S), out.shape
    max_err = float(jnp.max(jnp.abs(out - ref)))
    # bf16 matmuls vs f32 reference -> looser tolerance than an all-f32 version.
    assert jnp.allclose(out, ref, atol=5e-2, rtol=5e-2), max_err

    print("KERNEL_OK")
</pallas_src>

<mosaic_0001>
module attributes {stable_mosaic.version = 11 : i64} {
  func.func @_mm_kernel(%arg0: i32, %arg1: i32, %arg2: i32, %arg3: memref<16x32xbf16, #tpu.memory_space<vmem>>, %arg4: memref<32x32xbf16, #tpu.memory_space<vmem>>, %arg5: memref<1x32xf32, #tpu.memory_space<vmem>>, %arg6: memref<16x32xbf16, #tpu.memory_space<vmem>>, %arg7: memref<16x32xf32, #tpu.memory_space<vmem>>) attributes {dimension_semantics = [#tpu.dimension_semantics<parallel>, #tpu.dimension_semantics<parallel>, #tpu.dimension_semantics<arbitrary>], iteration_bounds = array<i64: 1, 1, 1>, scalar_prefetch = 0 : i64, scratch_operands = 1 : i64, tpu.core_type = #tpu.core_type<tc>, window_params = [{transform_indices = @transform_0, window_bounds = array<i64: 16, 32>}, {transform_indices = @transform_1, window_bounds = array<i64: 32, 32>}, {transform_indices = @transform_2, window_bounds = array<i64: 1, 32>}, {transform_indices = @transform_3, window_bounds = array<i64: 16, 32>}]} {
    %c0_i32 = arith.constant 0 : i32
    %0 = arith.cmpi eq, %arg2, %c0_i32 : i32
    %1 = arith.extui %0 : i1 to i32
    %c0_i32_0 = arith.constant 0 : i32
    %2 = arith.cmpi ne, %1, %c0_i32_0 : i32
    scf.if %2 {
      %cst_10 = arith.constant 0.000000e+00 : f32
      %12 = vector.broadcast %cst_10 : f32 to vector<16x32xf32>
      %c0_11 = arith.constant 0 : index
      %c0_12 = arith.constant 0 : index
      %13 = vector.load %arg7[%c0_11, %c0_12] : memref<16x32xf32, #tpu.memory_space<vmem>>, vector<16x32xf32>
      tpu.vector_store %arg7[%c0_11, %c0_12], %12 {strides = array<i32>} : memref<16x32xf32, #tpu.memory_space<vmem>>, vector<16x32xf32>,
    } else {
    }
    %c0 = arith.constant 0 : index
    %c0_1 = arith.constant 0 : index
    %3 = vector.load %arg7[%c0, %c0_1] : memref<16x32xf32, #tpu.memory_space<vmem>>, vector<16x32xf32>
    %c0_2 = arith.constant 0 : index
    %c0_3 = arith.constant 0 : index
    %4 = vector.load %arg3[%c0_2, %c0_3] : memref<16x32xbf16, #tpu.memory_space<vmem>>, vector<16x32xbf16>
    %c0_4 = arith.constant 0 : index
    %c0_5 = arith.constant 0 : index
    %5 = vector.load %arg4[%c0_4, %c0_5] : memref<32x32xbf16, #tpu.memory_space<vmem>>, vector<32x32xbf16>
    %cst = arith.constant dense<0.000000e+00> : vector<16x32xf32>
    %6 = tpu.matmul %4, %5, %cst {dimension_numbers = #tpu.dot_dimension_numbers<[1], [0], [0], [1], [0, 0, 1, 1], [], []>} : vector<16x32xbf16>, vector<32x32xbf16>, vector<16x32xf32> -> vector<16x32xf32>
    %7 = arith.addf %3, %6 : vector<16x32xf32>
    %c0_6 = arith.constant 0 : index
    %c0_7 = arith.constant 0 : index
    %8 = vector.load %arg7[%c0_6, %c0_7] : memref<16x32xf32, #tpu.memory_space<vmem>>, vector<16x32xf32>
    tpu.vector_store %arg7[%c0_6, %c0_7], %7 {strides = array<i32>} : memref<16x32xf32, #tpu.memory_space<vmem>>, vector<16x32xf32>,
    %c0_i32_8 = arith.constant 0 : i32
    %9 = arith.cmpi eq, %arg2, %c0_i32_8 : i32
    %10 = arith.extui %9 : i1 to i32
    %c0_i32_9 = arith.constant 0 : i32
    %11 = arith.cmpi ne, %10, %c0_i32_9 : i32
    scf.if %11 {
      %c0_10 = arith.constant 0 : index
      %c0_11 = arith.constant 0 : index
      %12 = vector.load %arg7[%c0_10, %c0_11] : memref<16x32xf32, #tpu.memory_space<vmem>>, vector<16x32xf32>
      %c0_12 = arith.constant 0 : index
      %c0_13 = arith.constant 0 : index
      %13 = vector.load %arg5[%c0_12, %c0_13] : memref<1x32xf32, #tpu.memory_space<vmem>>, vector<1x32xf32>
      %14 = vector.broadcast %13 : vector<1x32xf32> to vector<16x32xf32>
      %15 = arith.addf %12, %14 : vector<16x32xf32>
      %16 = arith.truncf %15 : vector<16x32xf32> to vector<16x32xbf16>
      %c0_14 = arith.constant 0 : index
      %c0_15 = arith.constant 0 : index
      %17 = vector.load %arg6[%c0_14, %c0_15] : memref<16x32xbf16, #tpu.memory_space<vmem>>, vector<16x32xbf16>
      tpu.vector_store %arg6[%c0_14, %c0_15], %16 {strides = array<i32>} : memref<16x32xbf16, #tpu.memory_space<vmem>>, vector<16x32xbf16>,
    } else {
    }
    return
  }
  func.func @transform_0(%arg0: i32, %arg1: i32, %arg2: i32) -> (i32, i32) {
    %c0_i32 = arith.constant 0 : i32
    return %arg0, %arg2 : i32, i32
  }
  func.func @transform_1(%arg0: i32, %arg1: i32, %arg2: i32) -> (i32, i32) {
    %c0_i32 = arith.constant 0 : i32
    return %arg2, %arg1 : i32, i32
  }
  func.func @transform_2(%arg0: i32, %arg1: i32, %arg2: i32) -> (i32, i32) {
    %c0_i32 = arith.constant 0 : i32
    %c0_i32_0 = arith.constant 0 : i32
    return %c0_i32, %arg1 : i32, i32
  }
  func.func @transform_3(%arg0: i32, %arg1: i32, %arg2: i32) -> (i32, i32) {
    %c0_i32 = arith.constant 0 : i32
    return %arg0, %arg1 : i32, i32
  }
}

module attributes {stable_mosaic.version = 11 : i64} {
  func.func @_flash_attn_kernel(%arg0: i32, %arg1: i32, %arg2: i32, %arg3: memref<1x8x32xbf16, #tpu.memory_space<vmem>>, %arg4: memref<1x8x32xbf16, #tpu.memory_space<vmem>>, %arg5: memref<1x8x32xbf16, #tpu.memory_space<vmem>>, %arg6: memref<1x8x32xbf16, #tpu.memory_space<vmem>>, %arg7: memref<8x4xf32, #tpu.memory_space<vmem>>, %arg8: memref<8x4xf32, #tpu.memory_space<vmem>>, %arg9: memref<8x32xf32, #tpu.memory_space<vmem>>) attributes {dimension_semantics = [#tpu.dimension_semantics<parallel>, #tpu.dimension_semantics<parallel>, #tpu.dimension_semantics<arbitrary>], iteration_bounds = array<i64: 2, 1, 1>, scalar_prefetch = 0 : i64, scratch_operands = 3 : i64, tpu.core_type = #tpu.core_type<tc>, window_params = [{transform_indices = @transform_0, window_bounds = array<i64: 1, 8, 32>}, {transform_indices = @transform_1, window_bounds = array<i64: 1, 8, 32>}, {transform_indices = @transform_2, window_bounds = array<i64: 1, 8, 32>}, {transform_indices = @transform_3, window_bounds = array<i64: 1, 8, 32>}]} {
    %c0_i32 = arith.constant 0 : i32
    %0 = arith.cmpi eq, %arg2, %c0_i32 : i32
    %1 = arith.extui %0 : i1 to i32
    %c0_i32_0 = arith.constant 0 : i32
    %2 = arith.cmpi ne, %1, %c0_i32_0 : i32
    scf.if %2 {
      %cst = arith.constant 0xFF800000 : f32
      %12 = vector.broadcast %cst : f32 to vector<8x4xf32>
      %c0 = arith.constant 0 : index
      %c0_5 = arith.constant 0 : index
      %13 = vector.load %arg7[%c0, %c0_5] : memref<8x4xf32, #tpu.memory_space<vmem>>, vector<8x4xf32>
      tpu.vector_store %arg7[%c0, %c0_5], %12 {strides = array<i32>} : memref<8x4xf32, #tpu.memory_space<vmem>>, vector<8x4xf32>,
      %cst_6 = arith.constant 0.000000e+00 : f32
      %14 = vector.broadcast %cst_6 : f32 to vector<8x4xf32>
      %c0_7 = arith.constant 0 : index
      %c0_8 = arith.constant 0 : index
      %15 = vector.load %arg8[%c0_7, %c0_8] : memref<8x4xf32, #tpu.memory_space<vmem>>, vector<8x4xf32>
      tpu.vector_store %arg8[%c0_7, %c0_8], %14 {strides = array<i32>} : memref<8x4xf32, #tpu.memory_space<vmem>>, vector<8x4xf32>,
      %cst_9 = arith.constant 0.000000e+00 : f32
      %16 = vector.broadcast %cst_9 : f32 to vector<8x32xf32>
      %c0_10 = arith.constant 0 : index
      %c0_11 = arith.constant 0 : index
      %17 = vector.load %arg9[%c0_10, %c0_11] : memref<8x32xf32, #tpu.memory_space<vmem>>, vector<8x32xf32>
      tpu.vector_store %arg9[%c0_10, %c0_11], %16 {strides = array<i32>} : memref<8x32xf32, #tpu.memory_space<vmem>>, vector<8x32xf32>,
    } else {
    }
    %c8_i32 = arith.constant 8 : i32
    %3 = arith.muli %arg2, %c8_i32 : i32
    %c8_i32_1 = arith.constant 8 : i32
    %4 = arith.muli %arg1, %c8_i32_1 : i32
    %c7_i32 = arith.constant 7 : i32
    %5 = arith.addi %4, %c7_i32 : i32
    %6 = arith.cmpi sle, %3, %5 : i32
    %7 = arith.extui %6 : i1 to i32
    %c0_i32_2 = arith.constant 0 : i32
    %8 = arith.cmpi ne, %7, %c0_i32_2 : i32
    scf.if %8 {
      %c0 = arith.constant 0 : index
      %c0_5 = arith.constant 0 : index
      %c0_6 = arith.constant 0 : index
      %12 = vector.load %arg3[%c0, %c0_5, %c0_6] : memref<1x8x32xbf16, #tpu.memory_space<vmem>>, vector<1x8x32xbf16>
      %13 = vector.shape_cast %12 : vector<1x8x32xbf16> to vector<8x32xbf16>
      %cst = arith.constant 3.535160e-01 : bf16
      %14 = vector.broadcast %cst : bf16 to vector<8x32xbf16>
      %15 = arith.mulf %13, %14 : vector<8x32xbf16>
      %c0_7 = arith.constant 0 : index
      %c0_8 = arith.constant 0 : index
      %c0_9 = arith.constant 0 : index
      %16 = vector.load %arg4[%c0_7, %c0_8, %c0_9] : memref<1x8x32xbf16, #tpu.memory_space<vmem>>, vector<1x8x32xbf16>
      %17 = vector.shape_cast %16 : vector<1x8x32xbf16> to vector<8x32xbf16>
      %c0_10 = arith.constant 0 : index
      %c0_11 = arith.constant 0 : index
      %c0_12 = arith.constant 0 : index
      %18 = vector.load %arg5[%c0_10, %c0_11, %c0_12] : memref<1x8x32xbf16, #tpu.memory_space<vmem>>, vector<1x8x32xbf16>
      %19 = vector.shape_cast %18 : vector<1x8x32xbf16> to vector<8x32xbf16>
      %c8_i32_13 = arith.constant 8 : i32
      %20 = arith.muli %arg1, %c8_i32_13 : i32
      %21 = tpu.iota {dimensions = array<i32: 0>} : vector<8x8xi32>
      %22 = vector.broadcast %20 : i32 to vector<8x8xi32>
      %23 = arith.addi %22, %21 : vector<8x8xi32>
      %c8_i32_14 = arith.constant 8 : i32
      %24 = arith.muli %arg2, %c8_i32_14 : i32
      %25 = tpu.iota {dimensions = array<i32: 1>} : vector<8x8xi32>
      %26 = vector.broadcast %24 : i32 to vector<8x8xi32>
      %27 = arith.addi %26, %25 : vector<8x8xi32>
      %28 = arith.cmpi sle, %27, %23 : vector<8x8xi32>
      %29 = vector.extract_strided_slice %15 {offsets = [0, 0], sizes = [8, 8], strides = [1, 1]} : vector<8x32xbf16> to vector<8x8xbf16>
      %30 = vector.extract_strided_slice %17 {offsets = [0, 0], sizes = [8, 8], strides = [1, 1]} : vector<8x32xbf16> to vector<8x8xbf16>
      %cst_15 = arith.constant dense<0.000000e+00> : vector<8x8xf32>
      %31 = tpu.matmul %29, %30, %cst_15 {dimension_numbers = #tpu.dot_dimension_numbers<[1], [1], [0], [0], [0, 0, 1, 0], [], []>} : vector<8x8xbf16>, vector<8x8xbf16>, vector<8x8xf32> -> vector<8x8xf32>
      %cst_16 = arith.constant -1.000000e+30 : f32
      %32 = vector.broadcast %cst_16 : f32 to vector<8x8xf32>
      %33 = arith.select %28, %31, %32 : vector<8x8xi1>, vector<8x8xf32>
      %c0_17 = arith.constant 0 : index
      %c0_18 = arith.constant 0 : index
      %34 = vector.load %arg7[%c0_17, %c0_18] : memref<8x4xf32, #tpu.memory_space<vmem>>, vector<8x1xf32>
      %cst_19 = arith.constant dense<0xFF800000> : vector<8xf32>
      %35 = vector.multi_reduction <maximumf>, %33, %cst_19 [1] : vector<8x8xf32> to vector<8xf32>
      %36 = vector.shape_cast %35 : vector<8xf32> to vector<8x1xf32>
      %37 = arith.maximumf %34, %36 : vector<8x1xf32>
      %38 = arith.subf %34, %37 : vector<8x1xf32>
      %39 = math.exp %38 : vector<8x1xf32>
      %40 = vector.broadcast %37 : vector<8x1xf32> to vector<8x8xf32>
      %41 = arith.subf %33, %40 : vector<8x8xf32>
      %42 = math.exp %41 : vector<8x8xf32>
      %c0_20 = arith.constant 0 : index
      %c0_21 = arith.constant 0 : index
      %43 = vector.load %arg8[%c0_20, %c0_21] : memref<8x4xf32, #tpu.memory_space<vmem>>, vector<8x1xf32>
      %44 = arith.mulf %39, %43 : vector<8x1xf32>
      %cst_22 = arith.constant dense<0.000000e+00> : vector<8xf32>
      %45 = vector.multi_reduction <add>, %42, %cst_22 [1] : vector<8x8xf32> to vector<8xf32>
      %46 = vector.shape_cast %45 : vector<8xf32> to vector<8x1xf32>
      %47 = arith.addf %44, %46 : vector<8x1xf32>
      %c0_23 = arith.constant 0 : index
      %c0_24 = arith.constant 0 : index
      %48 = vector.load %arg8[%c0_23, %c0_24] : memref<8x4xf32, #tpu.memory_space<vmem>>, vector<8x1xf32>
      tpu.vector_store %arg8[%c0_23, %c0_24], %47 {strides = array<i32>} : memref<8x4xf32, #tpu.memory_space<vmem>>, vector<8x1xf32>,
      %c0_25 = arith.constant 0 : index
      %c0_26 = arith.constant 0 : index
      %49 = vector.load %arg9[%c0_25, %c0_26] : memref<8x32xf32, #tpu.memory_space<vmem>>, vector<8x8xf32>
      %50 = vector.broadcast %39 : vector<8x1xf32> to vector<8x8xf32>
      %51 = arith.mulf %50, %49 : vector<8x8xf32>
      %52 = arith.truncf %42 : vector<8x8xf32> to vector<8x8xbf16>
      %53 = vector.extract_strided_slice %19 {offsets = [0, 0], sizes = [8, 8], strides = [1, 1]} : vector<8x32xbf16> to vector<8x8xbf16>
      %cst_27 = arith.constant dense<0.000000e+00> : vector<8x8xf32>
      %54 = tpu.matmul %52, %53, %cst_27 {dimension_numbers = #tpu.dot_dimension_numbers<[1], [0], [0], [1], [0, 0, 1, 1], [], []>} : vector<8x8xbf16>, vector<8x8xbf16>, vector<8x8xf32> -> vector<8x8xf32>
      %55 = arith.addf %51, %54 : vector<8x8xf32>
      %c0_28 = arith.constant 0 : index
      %c0_29 = arith.constant 0 : index
      %56 = vector.load %arg9[%c0_28, %c0_29] : memref<8x32xf32, #tpu.memory_space<vmem>>, vector<8x8xf32>
      tpu.vector_store %arg9[%c0_28, %c0_29], %55 {strides = array<i32>} : memref<8x32xf32, #tpu.memory_space<vmem>>, vector<8x8xf32>,
      %c0_30 = arith.constant 0 : index
      %c0_31 = arith.constant 0 : index
      %57 = vector.load %arg7[%c0_30, %c0_31] : memref<8x4xf32, #tpu.memory_space<vmem>>, vector<8x1xf32>
      tpu.vector_store %arg7[%c0_30, %c0_31], %37 {strides = array<i32>} : memref<8x4xf32, #tpu.memory_space<vmem>>, vector<8x1xf32>,
      %58 = vector.extract_strided_slice %15 {offsets = [0, 8], sizes = [8, 8], strides = [1, 1]} : vector<8x32xbf16> to vector<8x8xbf16>
      %59 = vector.extract_strided_slice %17 {offsets = [0, 8], sizes = [8, 8], strides = [1, 1]} : vector<8x32xbf16> to vector<8x8xbf16>
      %cst_32 = arith.constant dense<0.000000e+00> : vector<8x8xf32>
      %60 = tpu.matmul %58, %59, %cst_32 {dimension_numbers = #tpu.dot_dimension_numbers<[1], [1], [0], [0], [0, 0, 1, 0], [], []>} : vector<8x8xbf16>, vector<8x8xbf16>, vector<8x8xf32> -> vector<8x8xf32>
      %cst_33 = arith.constant -1.000000e+30 : f32
      %61 = vector.broadcast %cst_33 : f32 to vector<8x8xf32>
      %62 = arith.select %28, %60, %61 : vector<8x8xi1>, vector<8x8xf32>
      %c0_34 = arith.constant 0 : index
      %c1 = arith.constant 1 : index
      %63 = vector.load %arg7[%c0_34, %c1] : memref<8x4xf32, #tpu.memory_space<vmem>>, vector<8x1xf32>
      %cst_35 = arith.constant dense<0xFF800000> : vector<8xf32>
      %64 = vector.multi_reduction <maximumf>, %62, %cst_35 [1] : vector<8x8xf32> to vector<8xf32>
      %65 = vector.shape_cast %64 : vector<8xf32> to vector<8x1xf32>
      %66 = arith.maximumf %63, %65 : vector<8x1xf32>
      %67 = arith.subf %63, %66 : vector<8x1xf32>
      %68 = math.exp %67 : vector<8x1xf32>
      %69 = vector.broadcast %66 : vector<8x1xf32> to vector<8x8xf32>
      %70 = arith.subf %62, %69 : vector<8x8xf32>
      %71 = math.exp %70 : vector<8x8xf32>
      %c0_36 = arith.constant 0 : index
      %c1_37 = arith.constant 1 : index
      %72 = vector.load %arg8[%c0_36, %c1_37] : memref<8x4xf32, #tpu.memory_space<vmem>>, vector<8x1xf32>
      %73 = arith.mulf %68, %72 : vector<8x1xf32>
      %cst_38 = arith.constant dense<0.000000e+00> : vector<8xf32>
      %74 = vector.multi_reduction <add>, %71, %cst_38 [1] : vector<8x8xf32> to vector<8xf32>
      %75 = vector.shape_cast %74 : vector<8xf32> to vector<8x1xf32>
      %76 = arith.addf %73, %75 : vector<8x1xf32>
      %c0_39 = arith.constant 0 : index
      %c1_40 = arith.constant 1 : index
      %77 = vector.load %arg8[%c0_39, %c1_40] : memref<8x4xf32, #tpu.memory_space<vmem>>, vector<8x1xf32>
      tpu.vector_store %arg8[%c0_39, %c1_40], %76 {strides = array<i32>} : memref<8x4xf32, #tpu.memory_space<vmem>>, vector<8x1xf32>,
      %c0_41 = arith.constant 0 : index
      %c8 = arith.constant 8 : index
      %78 = vector.load %arg9[%c0_41, %c8] : memref<8x32xf32, #tpu.memory_space<vmem>>, vector<8x8xf32>
      %79 = vector.broadcast %68 : vector<8x1xf32> to vector<8x8xf32>
      %80 = arith.mulf %79, %78 : vector<8x8xf32>
      %81 = arith.truncf %71 : vector<8x8xf32> to vector<8x8xbf16>
      %82 = vector.extract_strided_slice %19 {offsets = [0, 8], sizes = [8, 8], strides = [1, 1]} : vector<8x32xbf16> to vector<8x8xbf16>
      %cst_42 = arith.constant dense<0.000000e+00> : vector<8x8xf32>
      %83 = tpu.matmul %81, %82, %cst_42 {dimension_numbers = #tpu.dot_dimension_numbers<[1], [0], [0], [1], [0, 0, 1, 1], [], []>} : vector<8x8xbf16>, vector<8x8xbf16>, vector<8x8xf32> -> vector<8x8xf32>
      %84 = arith.addf %80, %83 : vector<8x8xf32>
      %c0_43 = arith.constant 0 : index
      %c8_44 = arith.constant 8 : index
      %85 = vector.load %arg9[%c0_43, %c8_44] : memref<8x32xf32, #tpu.memory_space<vmem>>, vector<8x8xf32>
      tpu.vector_store %arg9[%c0_43, %c8_44], %84 {strides = array<i32>} : memref<8x32xf32, #tpu.memory_space<vmem>>, vector<8x8xf32>,
      %c0_45 = arith.constant 0 : index
      %c1_46 = arith.constant 1 : index
      %86 = vector.load %arg7[%c0_45, %c1_46] : memref<8x4xf32, #tpu.memory_space<vmem>>, vector<8x1xf32>
      tpu.vector_store %arg7[%c0_45, %c1_46], %66 {strides = array<i32>} : memref<8x4xf32, #tpu.memory_space<vmem>>, vector<8x1xf32>,
      %87 = vector.extract_strided_slice %15 {offsets = [0, 16], sizes = [8, 8], strides = [1, 1]} : vector<8x32xbf16> to vector<8x8xbf16>
      %88 = vector.extract_strided_slice %17 {offsets = [0, 16], sizes = [8, 8], strides = [1, 1]} : vector<8x32xbf16> to vector<8x8xbf16>
      %cst_47 = arith.constant dense<0.000000e+00> : vector<8x8xf32>
      %89 = tpu.matmul %87, %88, %cst_47 {dimension_numbers = #tpu.dot_dimension_numbers<[1], [1], [0], [0], [0, 0, 1, 0], [], []>} : vector<8x8xbf16>, vector<8x8xbf16>, vector<8x8xf32> -> vector<8x8xf32>
      %cst_48 = arith.constant -1.000000e+30 : f32
      %90 = vector.broadcast %cst_48 : f32 to vector<8x8xf32>
      %91 = arith.select %28, %89, %90 : vector<8x8xi1>, vector<8x8xf32>
      %c0_49 = arith.constant 0 : index
      %c2 = arith.constant 2 : index
      %92 = vector.load %arg7[%c0_49, %c2] : memref<8x4xf32, #tpu.memory_space<vmem>>, vector<8x1xf32>
      %cst_50 = arith.constant dense<0xFF800000> : vector<8xf32>
      %93 = vector.multi_reduction <maximumf>, %91, %cst_50 [1] : vector<8x8xf32> to vector<8xf32>
      %94 = vector.shape_cast %93 : vector<8xf32> to vector<8x1xf32>
      %95 = arith.maximumf %92, %94 : vector<8x1xf32>
      %96 = arith.subf %92, %95 : vector<8x1xf32>
      %97 = math.exp %96 : vector<8x1xf32>
      %98 = vector.broadcast %95 : vector<8x1xf32> to vector<8x8xf32>
      %99 = arith.subf %91, %98 : vector<8x8xf32>
      %100 = math.exp %99 : vector<8x8xf32>
      %c0_51 = arith.constant 0 : index
      %c2_52 = arith.constant 2 : index
      %101 = vector.load %arg8[%c0_51, %c2_52] : memref<8x4xf32, #tpu.memory_space<vmem>>, vector<8x1xf32>
      %102 = arith.mulf %97, %101 : vector<8x1xf32>
      %cst_53 = arith.constant dense<0.000000e+00> : vector<8xf32>
      %103 = vector.multi_reduction <add>, %100, %cst_53 [1] : vector<8x8xf32> to vector<8xf32>
      %104 = vector.shape_cast %103 : vector<8xf32> to vector<8x1xf32>
      %105 = arith.addf %102, %104 : vector<8x1xf32>
      %c0_54 = arith.constant 0 : index
      %c2_55 = arith.constant 2 : index
      %106 = vector.load %arg8[%c0_54, %c2_55] : memref<8x4xf32, #tpu.memory_space<vmem>>, vector<8x1xf32>
      tpu.vector_store %arg8[%c0_54, %c2_55], %105 {strides = array<i32>} : memref<8x4xf32, #tpu.memory_space<vmem>>, vector<8x1xf32>,
      %c0_56 = arith.constant 0 : index
      %c16 = arith.constant 16 : index
      %107 = vector.load %arg9[%c0_56, %c16] : memref<8x32xf32, #tpu.memory_space<vmem>>, vector<8x8xf32>
      %108 = vector.broadcast %97 : vector<8x1xf32> to vector<8x8xf32>
      %109 = arith.mulf %108, %107 : vector<8x8xf32>
      %110 = arith.truncf %100 : vector<8x8xf32> to vector<8x8xbf16>
      %111 = vector.extract_strided_slice %19 {offsets = [0, 16], sizes = [8, 8], strides = [1, 1]} : vector<8x32xbf16> to vector<8x8xbf16>
      %cst_57 = arith.constant dense<0.000000e+00> : vector<8x8xf32>
      %112 = tpu.matmul %110, %111, %cst_57 {dimension_numbers = #tpu.dot_dimension_numbers<[1], [0], [0], [1], [0, 0, 1, 1], [], []>} : vector<8x8xbf16>, vector<8x8xbf16>, vector<8x8xf32> -> vector<8x8xf32>
      %113 = arith.addf %109, %112 : vector<8x8xf32>
      %c0_58 = arith.constant 0 : index
      %c16_59 = arith.constant 16 : index
      %114 = vector.load %arg9[%c0_58, %c16_59] : memref<8x32xf32, #tpu.memory_space<vmem>>, vector<8x8xf32>
      tpu.vector_store %arg9[%c0_58, %c16_59], %113 {strides = array<i32>} : memref<8x32xf32, #tpu.memory_space<vmem>>, vector<8x8xf32>,
      %c0_60 = arith.constant 0 : index
      %c2_61 = arith.constant 2 : index
      %115 = vector.load %arg7[%c0_60, %c2_61] : memref<8x4xf32, #tpu.memory_space<vmem>>, vector<8x1xf32>
      tpu.vector_store %arg7[%c0_60, %c2_61], %95 {strides = array<i32>} : memref<8x4xf32, #tpu.memory_space<vmem>>, vector<8x1xf32>,
      %116 = vector.extract_strided_slice %15 {offsets = [0, 24], sizes = [8, 8], strides = [1, 1]} : vector<8x32xbf16> to vector<8x8xbf16>
      %117 = vector.extract_strided_slice %17 {offsets = [0, 24], sizes = [8, 8], strides = [1, 1]} : vector<8x32xbf16> to vector<8x8xbf16>
      %cst_62 = arith.constant dense<0.000000e+00> : vector<8x8xf32>
      %118 = tpu.matmul %116, %117, %cst_62 {dimension_numbers = #tpu.dot_dimension_numbers<[1], [1], [0], [0], [0, 0, 1, 0], [], []>} : vector<8x8xbf16>, vector<8x8xbf16>, vector<8x8xf32> -> vector<8x8xf32>
      %cst_63 = arith.constant -1.000000e+30 : f32
      %119 = vector.broadcast %cst_63 : f32 to vector<8x8xf32>
      %120 = arith.select %28, %118, %119 : vector<8x8xi1>, vector<8x8xf32>
      %c0_64 = arith.constant 0 : index
      %c3 = arith.constant 3 : index
      %121 = vector.load %arg7[%c0_64, %c3] : memref<8x4xf32, #tpu.memory_space<vmem>>, vector<8x1xf32>
      %cst_65 = arith.constant dense<0xFF800000> : vector<8xf32>
      %122 = vector.multi_reduction <maximumf>, %120, %cst_65 [1] : vector<8x8xf32> to vector<8xf32>
      %123 = vector.shape_cast %122 : vector<8xf32> to vector<8x1xf32>
      %124 = arith.maximumf %121, %123 : vector<8x1xf32>
      %125 = arith.subf %121, %124 : vector<8x1xf32>
      %126 = math.exp %125 : vector<8x1xf32>
      %127 = vector.broadcast %124 : vector<8x1xf32> to vector<8x8xf32>
      %128 = arith.subf %120, %127 : vector<8x8xf32>
      %129 = math.exp %128 : vector<8x8xf32>
      %c0_66 = arith.constant 0 : index
      %c3_67 = arith.constant 3 : index
      %130 = vector.load %arg8[%c0_66, %c3_67] : memref<8x4xf32, #tpu.memory_space<vmem>>, vector<8x1xf32>
      %131 = arith.mulf %126, %130 : vector<8x1xf32>
      %cst_68 = arith.constant dense<0.000000e+00> : vector<8xf32>
      %132 = vector.multi_reduction <add>, %129, %cst_68 [1] : vector<8x8xf32> to vector<8xf32>
      %133 = vector.shape_cast %132 : vector<8xf32> to vector<8x1xf32>
      %134 = arith.addf %131, %133 : vector<8x1xf32>
      %c0_69 = arith.constant 0 : index
      %c3_70 = arith.constant 3 : index
      %135 = vector.load %arg8[%c0_69, %c3_70] : memref<8x4xf32, #tpu.memory_space<vmem>>, vector<8x1xf32>
      tpu.vector_store %arg8[%c0_69, %c3_70], %134 {strides = array<i32>} : memref<8x4xf32, #tpu.memory_space<vmem>>, vector<8x1xf32>,
      %c0_71 = arith.constant 0 : index
      %c24 = arith.constant 24 : index
      %136 = vector.load %arg9[%c0_71, %c24] : memref<8x32xf32, #tpu.memory_space<vmem>>, vector<8x8xf32>
      %137 = vector.broadcast %126 : vector<8x1xf32> to vector<8x8xf32>
      %138 = arith.mulf %137, %136 : vector<8x8xf32>
      %139 = arith.truncf %129 : vector<8x8xf32> to vector<8x8xbf16>
      %140 = vector.extract_strided_slice %19 {offsets = [0, 24], sizes = [8, 8], strides = [1, 1]} : vector<8x32xbf16> to vector<8x8xbf16>
      %cst_72 = arith.constant dense<0.000000e+00> : vector<8x8xf32>
      %141 = tpu.matmul %139, %140, %cst_72 {dimension_numbers = #tpu.dot_dimension_numbers<[1], [0], [0], [1], [0, 0, 1, 1], [], []>} : vector<8x8xbf16>, vector<8x8xbf16>, vector<8x8xf32> -> vector<8x8xf32>
      %142 = arith.addf %138, %141 : vector<8x8xf32>
      %c0_73 = arith.constant 0 : index
      %c24_74 = arith.constant 24 : index
      %143 = vector.load %arg9[%c0_73, %c24_74] : memref<8x32xf32, #tpu.memory_space<vmem>>, vector<8x8xf32>
      tpu.vector_store %arg9[%c0_73, %c24_74], %142 {strides = array<i32>} : memref<8x32xf32, #tpu.memory_space<vmem>>, vector<8x8xf32>,
      %c0_75 = arith.constant 0 : index
      %c3_76 = arith.constant 3 : index
      %144 = vector.load %arg7[%c0_75, %c3_76] : memref<8x4xf32, #tpu.memory_space<vmem>>, vector<8x1xf32>
      tpu.vector_store %arg7[%c0_75, %c3_76], %124 {strides = array<i32>} : memref<8x4xf32, #tpu.memory_space<vmem>>, vector<8x1xf32>,
    } else {
    }
    %c0_i32_3 = arith.constant 0 : i32
    %9 = arith.cmpi eq, %arg2, %c0_i32_3 : i32
    %10 = arith.extui %9 : i1 to i32
    %c0_i32_4 = arith.constant 0 : i32
    %11 = arith.cmpi ne, %10, %c0_i32_4 : i32
    scf.if %11 {
      %c0 = arith.constant 0 : index
      %c0_5 = arith.constant 0 : index
      %12 = vector.load %arg8[%c0, %c0_5] : memref<8x4xf32, #tpu.memory_space<vmem>>, vector<8x1xf32>
      %13 = tpu.reciprocal %12 {approx = true} : vector<8x1xf32> -> vector<8x1xf32>
      %c0_6 = arith.constant 0 : index
      %c0_7 = arith.constant 0 : index
      %14 = vector.load %arg9[%c0_6, %c0_7] : memref<8x32xf32, #tpu.memory_space<vmem>>, vector<8x8xf32>
      %15 = vector.broadcast %13 : vector<8x1xf32> to vector<8x8xf32>
      %16 = arith.mulf %14, %15 : vector<8x8xf32>
      %17 = arith.truncf %16 : vector<8x8xf32> to vector<8x8xbf16>
      %c0_8 = arith.constant 0 : index
      %c0_9 = arith.constant 0 : index
      %c0_10 = arith.constant 0 : index
      %18 = vector.load %arg6[%c0_8, %c0_9, %c0_10] : memref<1x8x32xbf16, #tpu.memory_space<vmem>>, vector<1x8x8xbf16>
      %19 = vector.shape_cast %18 : vector<1x8x8xbf16> to vector<8x8xbf16>
      %20 = vector.shape_cast %17 : vector<8x8xbf16> to vector<1x8x8xbf16>
      tpu.vector_store %arg6[%c0_8, %c0_9, %c0_10], %20 {strides = array<i32>} : memref<1x8x32xbf16, #tpu.memory_space<vmem>>, vector<1x8x8xbf16>,
      %c0_11 = arith.constant 0 : index
      %c1 = arith.constant 1 : index
      %21 = vector.load %arg8[%c0_11, %c1] : memref<8x4xf32, #tpu.memory_space<vmem>>, vector<8x1xf32>
      %22 = tpu.reciprocal %21 {approx = true} : vector<8x1xf32> -> vector<8x1xf32>
      %c0_12 = arith.constant 0 : index
      %c8 = arith.constant 8 : index
      %23 = vector.load %arg9[%c0_12, %c8] : memref<8x32xf32, #tpu.memory_space<vmem>>, vector<8x8xf32>
      %24 = vector.broadcast %22 : vector<8x1xf32> to vector<8x8xf32>
      %25 = arith.mulf %23, %24 : vector<8x8xf32>
      %26 = arith.truncf %25 : vector<8x8xf32> to vector<8x8xbf16>
      %c0_13 = arith.constant 0 : index
      %c0_14 = arith.constant 0 : index
      %c8_15 = arith.constant 8 : index
      %27 = vector.load %arg6[%c0_13, %c0_14, %c8_15] : memref<1x8x32xbf16, #tpu.memory_space<vmem>>, vector<1x8x8xbf16>
      %28 = vector.shape_cast %27 : vector<1x8x8xbf16> to vector<8x8xbf16>
      %29 = vector.shape_cast %26 : vector<8x8xbf16> to vector<1x8x8xbf16>
      tpu.vector_store %arg6[%c0_13, %c0_14, %c8_15], %29 {strides = array<i32>} : memref<1x8x32xbf16, #tpu.memory_space<vmem>>, vector<1x8x8xbf16>,
      %c0_16 = arith.constant 0 : index
      %c2 = arith.constant 2 : index
      %30 = vector.load %arg8[%c0_16, %c2] : memref<8x4xf32, #tpu.memory_space<vmem>>, vector<8x1xf32>
      %31 = tpu.reciprocal %30 {approx = true} : vector<8x1xf32> -> vector<8x1xf32>
      %c0_17 = arith.constant 0 : index
      %c16 = arith.constant 16 : index
      %32 = vector.load %arg9[%c0_17, %c16] : memref<8x32xf32, #tpu.memory_space<vmem>>, vector<8x8xf32>
      %33 = vector.broadcast %31 : vector<8x1xf32> to vector<8x8xf32>
      %34 = arith.mulf %32, %33 : vector<8x8xf32>
      %35 = arith.truncf %34 : vector<8x8xf32> to vector<8x8xbf16>
      %c0_18 = arith.constant 0 : index
      %c0_19 = arith.constant 0 : index
      %c16_20 = arith.constant 16 : index
      %36 = vector.load %arg6[%c0_18, %c0_19, %c16_20] : memref<1x8x32xbf16, #tpu.memory_space<vmem>>, vector<1x8x8xbf16>
      %37 = vector.shape_cast %36 : vector<1x8x8xbf16> to vector<8x8xbf16>
      %38 = vector.shape_cast %35 : vector<8x8xbf16> to vector<1x8x8xbf16>
      tpu.vector_store %arg6[%c0_18, %c0_19, %c16_20], %38 {strides = array<i32>} : memref<1x8x32xbf16, #tpu.memory_space<vmem>>, vector<1x8x8xbf16>,
      %c0_21 = arith.constant 0 : index
      %c3 = arith.constant 3 : index
      %39 = vector.load %arg8[%c0_21, %c3] : memref<8x4xf32, #tpu.memory_space<vmem>>, vector<8x1xf32>
      %40 = tpu.reciprocal %39 {approx = true} : vector<8x1xf32> -> vector<8x1xf32>
      %c0_22 = arith.constant 0 : index
      %c24 = arith.constant 24 : index
      %41 = vector.load %arg9[%c0_22, %c24] : memref<8x32xf32, #tpu.memory_space<vmem>>, vector<8x8xf32>
      %42 = vector.broadcast %40 : vector<8x1xf32> to vector<8x8xf32>
      %43 = arith.mulf %41, %42 : vector<8x8xf32>
      %44 = arith.truncf %43 : vector<8x8xf32> to vector<8x8xbf16>
      %c0_23 = arith.constant 0 : index
      %c0_24 = arith.constant 0 : index
      %c24_25 = arith.constant 24 : index
      %45 = vector.load %arg6[%c0_23, %c0_24, %c24_25] : memref<1x8x32xbf16, #tpu.memory_space<vmem>>, vector<1x8x8xbf16>
      %46 = vector.shape_cast %45 : vector<1x8x8xbf16> to vector<8x8xbf16>
      %47 = vector.shape_cast %44 : vector<8x8xbf16> to vector<1x8x8xbf16>
      tpu.vector_store %arg6[%c0_23, %c0_24, %c24_25], %47 {strides = array<i32>} : memref<1x8x32xbf16, #tpu.memory_space<vmem>>, vector<1x8x8xbf16>,
    } else {
    }
    return
  }
  func.func @transform_0(%arg0: i32, %arg1: i32, %arg2: i32) -> (i32, i32, i32) {
    %c0_i32 = arith.constant 0 : i32
    %c0_i32_0 = arith.constant 0 : i32
    return %arg0, %arg1, %c0_i32 : i32, i32, i32
  }
  func.func @transform_1(%arg0: i32, %arg1: i32, %arg2: i32) -> (i32, i32, i32) {
    %c0_i32 = arith.constant 0 : i32
    %c0_i32_0 = arith.constant 0 : i32
    return %arg0, %arg2, %c0_i32 : i32, i32, i32
  }
  func.func @transform_2(%arg0: i32, %arg1: i32, %arg2: i32) -> (i32, i32, i32) {
    %c0_i32 = arith.constant 0 : i32
    %c0_i32_0 = arith.constant 0 : i32
    return %arg0, %arg2, %c0_i32 : i32, i32, i32
  }
  func.func @transform_3(%arg0: i32, %arg1: i32, %arg2: i32) -> (i32, i32, i32) {
    %c0_i32 = arith.constant 0 : i32
    %c0_i32_0 = arith.constant 0 : i32
    return %arg0, %arg1, %c0_i32 : i32, i32, i32
  }
}

module attributes {stable_mosaic.version = 11 : i64} {
  func.func @_mm_add_ln_kernel(%arg0: i32, %arg1: i32, %arg2: memref<16x32xbf16, #tpu.memory_space<vmem>>, %arg3: memref<32x32xbf16, #tpu.memory_space<vmem>>, %arg4: memref<1x32xf32, #tpu.memory_space<vmem>>, %arg5: memref<16x32xbf16, #tpu.memory_space<vmem>>, %arg6: memref<1x32xf32, #tpu.memory_space<vmem>>, %arg7: memref<1x32xf32, #tpu.memory_space<vmem>>, %arg8: memref<16x32xbf16, #tpu.memory_space<vmem>>, %arg9: memref<16x32xf32, #tpu.memory_space<vmem>>) attributes {dimension_semantics = [#tpu.dimension_semantics<parallel>, #tpu.dimension_semantics<arbitrary>], iteration_bounds = array<i64: 1, 1>, scalar_prefetch = 0 : i64, scratch_operands = 1 : i64, tpu.core_type = #tpu.core_type<tc>, window_params = [{transform_indices = @transform_0, window_bounds = array<i64: 16, 32>}, {transform_indices = @transform_1, window_bounds = array<i64: 32, 32>}, {pipeline_mode = #tpu.pipeline_mode<synchronous>, transform_indices = @transform_2, window_bounds = array<i64: 1, 32>}, {transform_indices = @transform_3, window_bounds = array<i64: 16, 32>}, {pipeline_mode = #tpu.pipeline_mode<synchronous>, transform_indices = @transform_4, window_bounds = array<i64: 1, 32>}, {pipeline_mode = #tpu.pipeline_mode<synchronous>, transform_indices = @transform_5, window_bounds = array<i64: 1, 32>}, {transform_indices = @transform_6, window_bounds = array<i64: 16, 32>}]} {
    %c0_i32 = arith.constant 0 : i32
    %0 = arith.cmpi eq, %arg1, %c0_i32 : i32
    %1 = arith.extui %0 : i1 to i32
    %c0_i32_0 = arith.constant 0 : i32
    %2 = arith.cmpi ne, %1, %c0_i32_0 : i32
    scf.if %2 {
      %cst_10 = arith.constant 0.000000e+00 : f32
      %12 = vector.broadcast %cst_10 : f32 to vector<16x32xf32>
      %c0_11 = arith.constant 0 : index
      %c0_12 = arith.constant 0 : index
      %13 = vector.load %arg9[%c0_11, %c0_12] : memref<16x32xf32, #tpu.memory_space<vmem>>, vector<16x32xf32>
      tpu.vector_store %arg9[%c0_11, %c0_12], %12 {strides = array<i32>} : memref<16x32xf32, #tpu.memory_space<vmem>>, vector<16x32xf32>,
    } else {
    }
    %c0 = arith.constant 0 : index
    %c0_1 = arith.constant 0 : index
    %3 = vector.load %arg9[%c0, %c0_1] : memref<16x32xf32, #tpu.memory_space<vmem>>, vector<16x32xf32>
    %c0_2 = arith.constant 0 : index
    %c0_3 = arith.constant 0 : index
    %4 = vector.load %arg2[%c0_2, %c0_3] : memref<16x32xbf16, #tpu.memory_space<vmem>>, vector<16x32xbf16>
    %c0_4 = arith.constant 0 : index
    %c0_5 = arith.constant 0 : index
    %5 = vector.load %arg3[%c0_4, %c0_5] : memref<32x32xbf16, #tpu.memory_space<vmem>>, vector<32x32xbf16>
    %cst = arith.constant dense<0.000000e+00> : vector<16x32xf32>
    %6 = tpu.matmul %4, %5, %cst {dimension_numbers = #tpu.dot_dimension_numbers<[1], [0], [0], [1], [0, 0, 1, 1], [], []>} : vector<16x32xbf16>, vector<32x32xbf16>, vector<16x32xf32> -> vector<16x32xf32>
    %7 = arith.addf %3, %6 : vector<16x32xf32>
    %c0_6 = arith.constant 0 : index
    %c0_7 = arith.constant 0 : index
    %8 = vector.load %arg9[%c0_6, %c0_7] : memref<16x32xf32, #tpu.memory_space<vmem>>, vector<16x32xf32>
    tpu.vector_store %arg9[%c0_6, %c0_7], %7 {strides = array<i32>} : memref<16x32xf32, #tpu.memory_space<vmem>>, vector<16x32xf32>,
    %c0_i32_8 = arith.constant 0 : i32
    %9 = arith.cmpi eq, %arg1, %c0_i32_8 : i32
    %10 = arith.extui %9 : i1 to i32
    %c0_i32_9 = arith.constant 0 : i32
    %11 = arith.cmpi ne, %10, %c0_i32_9 : i32
    scf.if %11 {
      %c0_10 = arith.constant 0 : index
      %c0_11 = arith.constant 0 : index
      %12 = vector.load %arg9[%c0_10, %c0_11] : memref<16x32xf32, #tpu.memory_space<vmem>>, vector<16x32xf32>
      %c0_12 = arith.constant 0 : index
      %c0_13 = arith.constant 0 : index
      %13 = vector.load %arg4[%c0_12, %c0_13] : memref<1x32xf32, #tpu.memory_space<vmem>>, vector<1x32xf32>
      %14 = vector.broadcast %13 : vector<1x32xf32> to vector<16x32xf32>
      %15 = arith.addf %12, %14 : vector<16x32xf32>
      %c0_14 = arith.constant 0 : index
      %c0_15 = arith.constant 0 : index
      %16 = vector.load %arg5[%c0_14, %c0_15] : memref<16x32xbf16, #tpu.memory_space<vmem>>, vector<16x32xbf16>
      %17 = arith.extf %16 : vector<16x32xbf16> to vector<16x32xf32>
      %18 = arith.addf %15, %17 : vector<16x32xf32>
      %cst_16 = arith.constant dense<0.000000e+00> : vector<16xf32>
      %19 = vector.multi_reduction <add>, %18, %cst_16 [1] : vector<16x32xf32> to vector<16xf32>
      %20 = vector.shape_cast %19 : vector<16xf32> to vector<16x1xf32>
      %cst_17 = arith.constant 3.200000e+01 : f32
      %21 = vector.broadcast %cst_17 : f32 to vector<16x1xf32>
      %22 = arith.divf %20, %21 : vector<16x1xf32>
      %23 = vector.broadcast %22 : vector<16x1xf32> to vector<16x32xf32>
      %24 = arith.subf %18, %23 : vector<16x32xf32>
      %25 = arith.mulf %24, %24 : vector<16x32xf32>
      %cst_18 = arith.constant dense<0.000000e+00> : vector<16xf32>
      %26 = vector.multi_reduction <add>, %25, %cst_18 [1] : vector<16x32xf32> to vector<16xf32>
      %27 = vector.shape_cast %26 : vector<16xf32> to vector<16x1xf32>
      %cst_19 = arith.constant 3.200000e+01 : f32
      %28 = vector.broadcast %cst_19 : f32 to vector<16x1xf32>
      %29 = arith.divf %27, %28 : vector<16x1xf32>
      %30 = vector.broadcast %22 : vector<16x1xf32> to vector<16x32xf32>
      %31 = arith.subf %18, %30 : vector<16x32xf32>
      %cst_20 = arith.constant 9.99999974E-6 : f32
      %32 = vector.broadcast %cst_20 : f32 to vector<16x1xf32>
      %33 = arith.addf %29, %32 : vector<16x1xf32>
      %34 = math.rsqrt %33 : vector<16x1xf32>
      %35 = vector.broadcast %34 : vector<16x1xf32> to vector<16x32xf32>
      %36 = arith.mulf %31, %35 : vector<16x32xf32>
      %c0_21 = arith.constant 0 : index
      %c0_22 = arith.constant 0 : index
      %37 = vector.load %arg6[%c0_21, %c0_22] : memref<1x32xf32, #tpu.memory_space<vmem>>, vector<1x32xf32>
      %38 = vector.broadcast %37 : vector<1x32xf32> to vector<16x32xf32>
      %39 = arith.mulf %36, %38 : vector<16x32xf32>
      %c0_23 = arith.constant 0 : index
      %c0_24 = arith.constant 0 : index
      %40 = vector.load %arg7[%c0_23, %c0_24] : memref<1x32xf32, #tpu.memory_space<vmem>>, vector<1x32xf32>
      %41 = vector.broadcast %40 : vector<1x32xf32> to vector<16x32xf32>
      %42 = arith.addf %39, %41 : vector<16x32xf32>
      %43 = arith.truncf %42 : vector<16x32xf32> to vector<16x32xbf16>
      %c0_25 = arith.constant 0 : index
      %c0_26 = arith.constant 0 : index
      %44 = vector.load %arg8[%c0_25, %c0_26] : memref<16x32xbf16, #tpu.memory_space<vmem>>, vector<16x32xbf16>
      tpu.vector_store %arg8[%c0_25, %c0_26], %43 {strides = array<i32>} : memref<16x32xbf16, #tpu.memory_space<vmem>>, vector<16x32xbf16>,
    } else {
    }
    return
  }
  func.func @transform_0(%arg0: i32, %arg1: i32) -> (i32, i32) {
    %c0_i32 = arith.constant 0 : i32
    return %arg0, %arg1 : i32, i32
  }
  func.func @transform_1(%arg0: i32, %arg1: i32) -> (i32, i32) {
    %c0_i32 = arith.constant 0 : i32
    %c0_i32_0 = arith.constant 0 : i32
    return %arg1, %c0_i32 : i32, i32
  }
  func.func @transform_2(%arg0: i32, %arg1: i32) -> (i32, i32) {
    %c0_i32 = arith.constant 0 : i32
    %c0_i32_0 = arith.constant 0 : i32
    %c0_i32_1 = arith.constant 0 : i32
    return %c0_i32, %c0_i32_0 : i32, i32
  }
  func.func @transform_3(%arg0: i32, %arg1: i32) -> (i32, i32) {
    %c0_i32 = arith.constant 0 : i32
    %c0_i32_0 = arith.constant 0 : i32
    return %arg0, %c0_i32 : i32, i32
  }
  func.func @transform_4(%arg0: i32, %arg1: i32) -> (i32, i32) {
    %c0_i32 = arith.constant 0 : i32
    %c0_i32_0 = arith.constant 0 : i32
    %c0_i32_1 = arith.constant 0 : i32
    return %c0_i32, %c0_i32_0 : i32, i32
  }
  func.func @transform_5(%arg0: i32, %arg1: i32) -> (i32, i32) {
    %c0_i32 = arith.constant 0 : i32
    %c0_i32_0 = arith.constant 0 : i32
    %c0_i32_1 = arith.constant 0 : i32
    return %c0_i32, %c0_i32_0 : i32, i32
  }
  func.func @transform_6(%arg0: i32, %arg1: i32) -> (i32, i32) {
    %c0_i32 = arith.constant 0 : i32
    %c0_i32_0 = arith.constant 0 : i32
    return %arg0, %c0_i32 : i32, i32
  }
}

module attributes {stable_mosaic.version = 11 : i64} {
  func.func @_mm_kernel(%arg0: i32, %arg1: i32, %arg2: i32, %arg3: memref<16x32xbf16, #tpu.memory_space<vmem>>, %arg4: memref<32x128xbf16, #tpu.memory_space<vmem>>, %arg5: memref<1x128xf32, #tpu.memory_space<vmem>>, %arg6: memref<16x128xbf16, #tpu.memory_space<vmem>>, %arg7: memref<16x128xf32, #tpu.memory_space<vmem>>) attributes {dimension_semantics = [#tpu.dimension_semantics<parallel>, #tpu.dimension_semantics<parallel>, #tpu.dimension_semantics<arbitrary>], iteration_bounds = array<i64: 1, 1, 1>, scalar_prefetch = 0 : i64, scratch_operands = 1 : i64, tpu.core_type = #tpu.core_type<tc>, window_params = [{transform_indices = @transform_0, window_bounds = array<i64: 16, 32>}, {transform_indices = @transform_1, window_bounds = array<i64: 32, 128>}, {transform_indices = @transform_2, window_bounds = array<i64: 1, 128>}, {transform_indices = @transform_3, window_bounds = array<i64: 16, 128>}]} {
    %c0_i32 = arith.constant 0 : i32
    %0 = arith.cmpi eq, %arg2, %c0_i32 : i32
    %1 = arith.extui %0 : i1 to i32
    %c0_i32_0 = arith.constant 0 : i32
    %2 = arith.cmpi ne, %1, %c0_i32_0 : i32
    scf.if %2 {
      %cst_10 = arith.constant 0.000000e+00 : f32
      %12 = vector.broadcast %cst_10 : f32 to vector<16x128xf32>
      %c0_11 = arith.constant 0 : index
      %c0_12 = arith.constant 0 : index
      %13 = vector.load %arg7[%c0_11, %c0_12] : memref<16x128xf32, #tpu.memory_space<vmem>>, vector<16x128xf32>
      tpu.vector_store %arg7[%c0_11, %c0_12], %12 {strides = array<i32>} : memref<16x128xf32, #tpu.memory_space<vmem>>, vector<16x128xf32>,
    } else {
    }
    %c0 = arith.constant 0 : index
    %c0_1 = arith.constant 0 : index
    %3 = vector.load %arg7[%c0, %c0_1] : memref<16x128xf32, #tpu.memory_space<vmem>>, vector<16x128xf32>
    %c0_2 = arith.constant 0 : index
    %c0_3 = arith.constant 0 : index
    %4 = vector.load %arg3[%c0_2, %c0_3] : memref<16x32xbf16, #tpu.memory_space<vmem>>, vector<16x32xbf16>
    %c0_4 = arith.constant 0 : index
    %c0_5 = arith.constant 0 : index
    %5 = vector.load %arg4[%c0_4, %c0_5] : memref<32x128xbf16, #tpu.memory_space<vmem>>, vector<32x128xbf16>
    %cst = arith.constant dense<0.000000e+00> : vector<16x128xf32>
    %6 = tpu.matmul %4, %5, %cst {dimension_numbers = #tpu.dot_dimension_numbers<[1], [0], [0], [1], [0, 0, 1, 1], [], []>} : vector<16x32xbf16>, vector<32x128xbf16>, vector<16x128xf32> -> vector<16x128xf32>
    %7 = arith.addf %3, %6 : vector<16x128xf32>
    %c0_6 = arith.constant 0 : index
    %c0_7 = arith.constant 0 : index
    %8 = vector.load %arg7[%c0_6, %c0_7] : memref<16x128xf32, #tpu.memory_space<vmem>>, vector<16x128xf32>
    tpu.vector_store %arg7[%c0_6, %c0_7], %7 {strides = array<i32>} : memref<16x128xf32, #tpu.memory_space<vmem>>, vector<16x128xf32>,
    %c0_i32_8 = arith.constant 0 : i32
    %9 = arith.cmpi eq, %arg2, %c0_i32_8 : i32
    %10 = arith.extui %9 : i1 to i32
    %c0_i32_9 = arith.constant 0 : i32
    %11 = arith.cmpi ne, %10, %c0_i32_9 : i32
    scf.if %11 {
      %c0_10 = arith.constant 0 : index
      %c0_11 = arith.constant 0 : index
      %12 = vector.load %arg7[%c0_10, %c0_11] : memref<16x128xf32, #tpu.memory_space<vmem>>, vector<16x128xf32>
      %c0_12 = arith.constant 0 : index
      %c0_13 = arith.constant 0 : index
      %13 = vector.load %arg5[%c0_12, %c0_13] : memref<1x128xf32, #tpu.memory_space<vmem>>, vector<1x128xf32>
      %14 = vector.broadcast %13 : vector<1x128xf32> to vector<16x128xf32>
      %15 = arith.addf %12, %14 : vector<16x128xf32>
      %cst_14 = arith.constant 5.000000e-01 : f32
      %16 = vector.broadcast %cst_14 : f32 to vector<16x128xf32>
      %17 = arith.mulf %16, %15 : vector<16x128xf32>
      %cst_15 = arith.constant 0.707106769 : f32
      %18 = vector.broadcast %cst_15 : f32 to vector<16x128xf32>
      %19 = arith.mulf %15, %18 : vector<16x128xf32>
      %20 = math.erf %19 : vector<16x128xf32>
      %cst_16 = arith.constant 1.000000e+00 : f32
      %21 = vector.broadcast %cst_16 : f32 to vector<16x128xf32>
      %22 = arith.addf %21, %20 : vector<16x128xf32>
      %23 = arith.mulf %17, %22 : vector<16x128xf32>
      %24 = arith.truncf %23 : vector<16x128xf32> to vector<16x128xbf16>
      %c0_17 = arith.constant 0 : index
      %c0_18 = arith.constant 0 : index
      %25 = vector.load %arg6[%c0_17, %c0_18] : memref<16x128xbf16, #tpu.memory_space<vmem>>, vector<16x128xbf16>
      tpu.vector_store %arg6[%c0_17, %c0_18], %24 {strides = array<i32>} : memref<16x128xbf16, #tpu.memory_space<vmem>>, vector<16x128xbf16>,
    } else {
    }
    return
  }
  func.func @transform_0(%arg0: i32, %arg1: i32, %arg2: i32) -> (i32, i32) {
    %c0_i32 = arith.constant 0 : i32
    return %arg0, %arg2 : i32, i32
  }
  func.func @transform_1(%arg0: i32, %arg1: i32, %arg2: i32) -> (i32, i32) {
    %c0_i32 = arith.constant 0 : i32
    return %arg2, %arg1 : i32, i32
  }
  func.func @transform_2(%arg0: i32, %arg1: i32, %arg2: i32) -> (i32, i32) {
    %c0_i32 = arith.constant 0 : i32
    %c0_i32_0 = arith.constant 0 : i32
    return %c0_i32, %arg1 : i32, i32
  }
  func.func @transform_3(%arg0: i32, %arg1: i32, %arg2: i32) -> (i32, i32) {
    %c0_i32 = arith.constant 0 : i32
    return %arg0, %arg1 : i32, i32
  }
}

module attributes {stable_mosaic.version = 11 : i64} {
  func.func @_mm_add_ln_kernel(%arg0: i32, %arg1: i32, %arg2: memref<16x128xbf16, #tpu.memory_space<vmem>>, %arg3: memref<128x32xbf16, #tpu.memory_space<vmem>>, %arg4: memref<1x32xf32, #tpu.memory_space<vmem>>, %arg5: memref<16x32xbf16, #tpu.memory_space<vmem>>, %arg6: memref<1x32xf32, #tpu.memory_space<vmem>>, %arg7: memref<1x32xf32, #tpu.memory_space<vmem>>, %arg8: memref<16x32xbf16, #tpu.memory_space<vmem>>, %arg9: memref<16x32xf32, #tpu.memory_space<vmem>>) attributes {dimension_semantics = [#tpu.dimension_semantics<parallel>, #tpu.dimension_semantics<arbitrary>], iteration_bounds = array<i64: 1, 1>, scalar_prefetch = 0 : i64, scratch_operands = 1 : i64, tpu.core_type = #tpu.core_type<tc>, window_params = [{transform_indices = @transform_0, window_bounds = array<i64: 16, 128>}, {transform_indices = @transform_1, window_bounds = array<i64: 128, 32>}, {pipeline_mode = #tpu.pipeline_mode<synchronous>, transform_indices = @transform_2, window_bounds = array<i64: 1, 32>}, {transform_indices = @transform_3, window_bounds = array<i64: 16, 32>}, {pipeline_mode = #tpu.pipeline_mode<synchronous>, transform_indices = @transform_4, window_bounds = array<i64: 1, 32>}, {pipeline_mode = #tpu.pipeline_mode<synchronous>, transform_indices = @transform_5, window_bounds = array<i64: 1, 32>}, {transform_indices = @transform_6, window_bounds = array<i64: 16, 32>}]} {
    %c0_i32 = arith.constant 0 : i32
    %0 = arith.cmpi eq, %arg1, %c0_i32 : i32
    %1 = arith.extui %0 : i1 to i32
    %c0_i32_0 = arith.constant 0 : i32
    %2 = arith.cmpi ne, %1, %c0_i32_0 : i32
    scf.if %2 {
      %cst_10 = arith.constant 0.000000e+00 : f32
      %12 = vector.broadcast %cst_10 : f32 to vector<16x32xf32>
      %c0_11 = arith.constant 0 : index
      %c0_12 = arith.constant 0 : index
      %13 = vector.load %arg9[%c0_11, %c0_12] : memref<16x32xf32, #tpu.memory_space<vmem>>, vector<16x32xf32>
      tpu.vector_store %arg9[%c0_11, %c0_12], %12 {strides = array<i32>} : memref<16x32xf32, #tpu.memory_space<vmem>>, vector<16x32xf32>,
    } else {
    }
    %c0 = arith.constant 0 : index
    %c0_1 = arith.constant 0 : index
    %3 = vector.load %arg9[%c0, %c0_1] : memref<16x32xf32, #tpu.memory_space<vmem>>, vector<16x32xf32>
    %c0_2 = arith.constant 0 : index
    %c0_3 = arith.constant 0 : index
    %4 = vector.load %arg2[%c0_2, %c0_3] : memref<16x128xbf16, #tpu.memory_space<vmem>>, vector<16x128xbf16>
    %c0_4 = arith.constant 0 : index
    %c0_5 = arith.constant 0 : index
    %5 = vector.load %arg3[%c0_4, %c0_5] : memref<128x32xbf16, #tpu.memory_space<vmem>>, vector<128x32xbf16>
    %cst = arith.constant dense<0.000000e+00> : vector<16x32xf32>
    %6 = tpu.matmul %4, %5, %cst {dimension_numbers = #tpu.dot_dimension_numbers<[1], [0], [0], [1], [0, 0, 1, 1], [], []>} : vector<16x128xbf16>, vector<128x32xbf16>, vector<16x32xf32> -> vector<16x32xf32>
    %7 = arith.addf %3, %6 : vector<16x32xf32>
    %c0_6 = arith.constant 0 : index
    %c0_7 = arith.constant 0 : index
    %8 = vector.load %arg9[%c0_6, %c0_7] : memref<16x32xf32, #tpu.memory_space<vmem>>, vector<16x32xf32>
    tpu.vector_store %arg9[%c0_6, %c0_7], %7 {strides = array<i32>} : memref<16x32xf32, #tpu.memory_space<vmem>>, vector<16x32xf32>,
    %c0_i32_8 = arith.constant 0 : i32
    %9 = arith.cmpi eq, %arg1, %c0_i32_8 : i32
    %10 = arith.extui %9 : i1 to i32
    %c0_i32_9 = arith.constant 0 : i32
    %11 = arith.cmpi ne, %10, %c0_i32_9 : i32
    scf.if %11 {
      %c0_10 = arith.constant 0 : index
      %c0_11 = arith.constant 0 : index
      %12 = vector.load %arg9[%c0_10, %c0_11] : memref<16x32xf32, #tpu.memory_space<vmem>>, vector<16x32xf32>
      %c0_12 = arith.constant 0 : index
      %c0_13 = arith.constant 0 : index
      %13 = vector.load %arg4[%c0_12, %c0_13] : memref<1x32xf32, #tpu.memory_space<vmem>>, vector<1x32xf32>
      %14 = vector.broadcast %13 : vector<1x32xf32> to vector<16x32xf32>
      %15 = arith.addf %12, %14 : vector<16x32xf32>
      %c0_14 = arith.constant 0 : index
      %c0_15 = arith.constant 0 : index
      %16 = vector.load %arg5[%c0_14, %c0_15] : memref<16x32xbf16, #tpu.memory_space<vmem>>, vector<16x32xbf16>
      %17 = arith.extf %16 : vector<16x32xbf16> to vector<16x32xf32>
      %18 = arith.addf %15, %17 : vector<16x32xf32>
      %cst_16 = arith.constant dense<0.000000e+00> : vector<16xf32>
      %19 = vector.multi_reduction <add>, %18, %cst_16 [1] : vector<16x32xf32> to vector<16xf32>
      %20 = vector.shape_cast %19 : vector<16xf32> to vector<16x1xf32>
      %cst_17 = arith.constant 3.200000e+01 : f32
      %21 = vector.broadcast %cst_17 : f32 to vector<16x1xf32>
      %22 = arith.divf %20, %21 : vector<16x1xf32>
      %23 = vector.broadcast %22 : vector<16x1xf32> to vector<16x32xf32>
      %24 = arith.subf %18, %23 : vector<16x32xf32>
      %25 = arith.mulf %24, %24 : vector<16x32xf32>
      %cst_18 = arith.constant dense<0.000000e+00> : vector<16xf32>
      %26 = vector.multi_reduction <add>, %25, %cst_18 [1] : vector<16x32xf32> to vector<16xf32>
      %27 = vector.shape_cast %26 : vector<16xf32> to vector<16x1xf32>
      %cst_19 = arith.constant 3.200000e+01 : f32
      %28 = vector.broadcast %cst_19 : f32 to vector<16x1xf32>
      %29 = arith.divf %27, %28 : vector<16x1xf32>
      %30 = vector.broadcast %22 : vector<16x1xf32> to vector<16x32xf32>
      %31 = arith.subf %18, %30 : vector<16x32xf32>
      %cst_20 = arith.constant 9.99999974E-6 : f32
      %32 = vector.broadcast %cst_20 : f32 to vector<16x1xf32>
      %33 = arith.addf %29, %32 : vector<16x1xf32>
      %34 = math.rsqrt %33 : vector<16x1xf32>
      %35 = vector.broadcast %34 : vector<16x1xf32> to vector<16x32xf32>
      %36 = arith.mulf %31, %35 : vector<16x32xf32>
      %c0_21 = arith.constant 0 : index
      %c0_22 = arith.constant 0 : index
      %37 = vector.load %arg6[%c0_21, %c0_22] : memref<1x32xf32, #tpu.memory_space<vmem>>, vector<1x32xf32>
      %38 = vector.broadcast %37 : vector<1x32xf32> to vector<16x32xf32>
      %39 = arith.mulf %36, %38 : vector<16x32xf32>
      %c0_23 = arith.constant 0 : index
      %c0_24 = arith.constant 0 : index
      %40 = vector.load %arg7[%c0_23, %c0_24] : memref<1x32xf32, #tpu.memory_space<vmem>>, vector<1x32xf32>
      %41 = vector.broadcast %40 : vector<1x32xf32> to vector<16x32xf32>
      %42 = arith.addf %39, %41 : vector<16x32xf32>
      %43 = arith.truncf %42 : vector<16x32xf32> to vector<16x32xbf16>
      %c0_25 = arith.constant 0 : index
      %c0_26 = arith.constant 0 : index
      %44 = vector.load %arg8[%c0_25, %c0_26] : memref<16x32xbf16, #tpu.memory_space<vmem>>, vector<16x32xbf16>
      tpu.vector_store %arg8[%c0_25, %c0_26], %43 {strides = array<i32>} : memref<16x32xbf16, #tpu.memory_space<vmem>>, vector<16x32xbf16>,
    } else {
    }
    return
  }
  func.func @transform_0(%arg0: i32, %arg1: i32) -> (i32, i32) {
    %c0_i32 = arith.constant 0 : i32
    return %arg0, %arg1 : i32, i32
  }
  func.func @transform_1(%arg0: i32, %arg1: i32) -> (i32, i32) {
    %c0_i32 = arith.constant 0 : i32
    %c0_i32_0 = arith.constant 0 : i32
    return %arg1, %c0_i32 : i32, i32
  }
  func.func @transform_2(%arg0: i32, %arg1: i32) -> (i32, i32) {
    %c0_i32 = arith.constant 0 : i32
    %c0_i32_0 = arith.constant 0 : i32
    %c0_i32_1 = arith.constant 0 : i32
    return %c0_i32, %c0_i32_0 : i32, i32
  }
  func.func @transform_3(%arg0: i32, %arg1: i32) -> (i32, i32) {
    %c0_i32 = arith.constant 0 : i32
    %c0_i32_0 = arith.constant 0 : i32
    return %arg0, %c0_i32 : i32, i32
  }
  func.func @transform_4(%arg0: i32, %arg1: i32) -> (i32, i32) {
    %c0_i32 = arith.constant 0 : i32
    %c0_i32_0 = arith.constant 0 : i32
    %c0_i32_1 = arith.constant 0 : i32
    return %c0_i32, %c0_i32_0 : i32, i32
  }
  func.func @transform_5(%arg0: i32, %arg1: i32) -> (i32, i32) {
    %c0_i32 = arith.constant 0 : i32
    %c0_i32_0 = arith.constant 0 : i32
    %c0_i32_1 = arith.constant 0 : i32
    return %c0_i32, %c0_i32_0 : i32, i32
  }
  func.func @transform_6(%arg0: i32, %arg1: i32) -> (i32, i32) {
    %c0_i32 = arith.constant 0 : i32
    %c0_i32_0 = arith.constant 0 : i32
    return %arg0, %c0_i32 : i32, i32
  }
}

module attributes {stable_mosaic.version = 11 : i64} {
  func.func @_mm_kernel_accout(%arg0: i32, %arg1: i32, %arg2: i32, %arg3: memref<16x32xbf16, #tpu.memory_space<vmem>>, %arg4: memref<32x64xbf16, #tpu.memory_space<vmem>>, %arg5: memref<1x64xf32, #tpu.memory_space<vmem>>, %arg6: memref<16x64xf32, #tpu.memory_space<vmem>>) attributes {dimension_semantics = [#tpu.dimension_semantics<parallel>, #tpu.dimension_semantics<parallel>, #tpu.dimension_semantics<arbitrary>], iteration_bounds = array<i64: 1, 1, 1>, scalar_prefetch = 0 : i64, scratch_operands = 0 : i64, tpu.core_type = #tpu.core_type<tc>, window_params = [{transform_indices = @transform_0, window_bounds = array<i64: 16, 32>}, {transform_indices = @transform_1, window_bounds = array<i64: 32, 64>}, {transform_indices = @transform_2, window_bounds = array<i64: 1, 64>}, {transform_indices = @transform_3, window_bounds = array<i64: 16, 64>}]} {
    %c0_i32 = arith.constant 0 : i32
    %0 = arith.cmpi eq, %arg2, %c0_i32 : i32
    %1 = arith.extui %0 : i1 to i32
    %c0_i32_0 = arith.constant 0 : i32
    %2 = arith.cmpi ne, %1, %c0_i32_0 : i32
    scf.if %2 {
      %cst_10 = arith.constant 0.000000e+00 : f32
      %12 = vector.broadcast %cst_10 : f32 to vector<16x64xf32>
      %c0_11 = arith.constant 0 : index
      %c0_12 = arith.constant 0 : index
      %13 = vector.load %arg6[%c0_11, %c0_12] : memref<16x64xf32, #tpu.memory_space<vmem>>, vector<16x64xf32>
      tpu.vector_store %arg6[%c0_11, %c0_12], %12 {strides = array<i32>} : memref<16x64xf32, #tpu.memory_space<vmem>>, vector<16x64xf32>,
    } else {
    }
    %c0 = arith.constant 0 : index
    %c0_1 = arith.constant 0 : index
    %3 = vector.load %arg6[%c0, %c0_1] : memref<16x64xf32, #tpu.memory_space<vmem>>, vector<16x64xf32>
    %c0_2 = arith.constant 0 : index
    %c0_3 = arith.constant 0 : index
    %4 = vector.load %arg3[%c0_2, %c0_3] : memref<16x32xbf16, #tpu.memory_space<vmem>>, vector<16x32xbf16>
    %c0_4 = arith.constant 0 : index
    %c0_5 = arith.constant 0 : index
    %5 = vector.load %arg4[%c0_4, %c0_5] : memref<32x64xbf16, #tpu.memory_space<vmem>>, vector<32x64xbf16>
    %cst = arith.constant dense<0.000000e+00> : vector<16x64xf32>
    %6 = tpu.matmul %4, %5, %cst {dimension_numbers = #tpu.dot_dimension_numbers<[1], [0], [0], [1], [0, 0, 1, 1], [], []>} : vector<16x32xbf16>, vector<32x64xbf16>, vector<16x64xf32> -> vector<16x64xf32>
    %7 = arith.addf %3, %6 : vector<16x64xf32>
    %c0_6 = arith.constant 0 : index
    %c0_7 = arith.constant 0 : index
    %8 = vector.load %arg6[%c0_6, %c0_7] : memref<16x64xf32, #tpu.memory_space<vmem>>, vector<16x64xf32>
    tpu.vector_store %arg6[%c0_6, %c0_7], %7 {strides = array<i32>} : memref<16x64xf32, #tpu.memory_space<vmem>>, vector<16x64xf32>,
    %c0_i32_8 = arith.constant 0 : i32
    %9 = arith.cmpi eq, %arg2, %c0_i32_8 : i32
    %10 = arith.extui %9 : i1 to i32
    %c0_i32_9 = arith.constant 0 : i32
    %11 = arith.cmpi ne, %10, %c0_i32_9 : i32
    scf.if %11 {
      %c0_10 = arith.constant 0 : index
      %c0_11 = arith.constant 0 : index
      %12 = vector.load %arg6[%c0_10, %c0_11] : memref<16x64xf32, #tpu.memory_space<vmem>>, vector<16x64xf32>
      %c0_12 = arith.constant 0 : index
      %c0_13 = arith.constant 0 : index
      %13 = vector.load %arg5[%c0_12, %c0_13] : memref<1x64xf32, #tpu.memory_space<vmem>>, vector<1x64xf32>
      %14 = vector.broadcast %13 : vector<1x64xf32> to vector<16x64xf32>
      %15 = arith.addf %12, %14 : vector<16x64xf32>
      %c0_14 = arith.constant 0 : index
      %c0_15 = arith.constant 0 : index
      %16 = vector.load %arg6[%c0_14, %c0_15] : memref<16x64xf32, #tpu.memory_space<vmem>>, vector<16x64xf32>
      tpu.vector_store %arg6[%c0_14, %c0_15], %15 {strides = array<i32>} : memref<16x64xf32, #tpu.memory_space<vmem>>, vector<16x64xf32>,
    } else {
    }
    return
  }
  func.func @transform_0(%arg0: i32, %arg1: i32, %arg2: i32) -> (i32, i32) {
    %c0_i32 = arith.constant 0 : i32
    return %arg0, %arg2 : i32, i32
  }
  func.func @transform_1(%arg0: i32, %arg1: i32, %arg2: i32) -> (i32, i32) {
    %c0_i32 = arith.constant 0 : i32
    return %arg2, %arg1 : i32, i32
  }
  func.func @transform_2(%arg0: i32, %arg1: i32, %arg2: i32) -> (i32, i32) {
    %c0_i32 = arith.constant 0 : i32
    %c0_i32_0 = arith.constant 0 : i32
    return %c0_i32, %arg1 : i32, i32
  }
  func.func @transform_3(%arg0: i32, %arg1: i32, %arg2: i32) -> (i32, i32) {
    %c0_i32 = arith.constant 0 : i32
    return %arg0, %arg1 : i32, i32
  }
}

</mosaic_0001>

<bundles_post_ra>
// kernel: model_forward.19
= control target key start
LH: loop header
LB: loop body
LE: loop exit
PB: predicated region body
PF: predicated region fallthrough
CT: control target
= control target key end

     0   :  { %vm28_vm0 = vcmask 261120   ;;  %v220_v0 = vmov 0.0   ;;  %vm221_vm1 = vmmov 0   ;;  %vm178_vm2 = vcmask 257024   ;;  %s293_s1 = inlined_call_operand.vmem [shape: bf16[32,32], index: 1, kind: input, shape index: {}]   ;;  %s294_s0 = inlined_call_operand.vmem [shape: bf16[16,32], index: 0, kind: input, shape index: {}]   ;;  %s295_s3 = inlined_call_operand.vmem [shape: bf16[16,32], index: 3, kind: input, shape index: {}]   ;;  %s296_s2 = inlined_call_operand.vmem [shape: f32[1,32], index: 2, kind: input, shape index: {}]   ;;  %s297_s4 = inlined_call_operand.vmem [shape: f32[1,32], index: 4, kind: input, shape index: {}]   ;;  %s298_s5 = inlined_call_operand.vmem [shape: f32[1,32], index: 5, kind: input, shape index: {}]   ;;  %s299_s6 = inlined_call_operand.vmem [shape: bf16[16,32], index: 6, kind: output, shape index: {}]  }
   0x1   :  { %203 = vmatprep.subr.bf16.mxu0 %v220_v0  ;;  %v213_v1 = vld [vmem:[%s293_s1] sm:$0xff]   ;;  %207 = vmatprep.mubr.msk.bf16.mxu0 %vm221_vm1, %v220_v0  ;;  %29 = vst.msk [vmem:[#allocation2] sm:$0xff] %vm28_vm0, %v220_v0  ;;  %30 = vst.msk [vmem:[#allocation2 + $0x8] sm:$0xff] %vm28_vm0, %v220_v0  ;;  %v214_v2 = vld [vmem:[%s293_s1 + $0x8] sm:$0xff]  }
   0x2   :  { %204 = vmatpush3.bf16.msra.mxu0 %v213_v1  ;;  %v215_v3 = vld [vmem:[%s294_s0] sm:$0xff]  }
   0x3   :  { %205 = vmatprep.subr.bf16.mxu0 %v220_v0  ;;  %v197_v12 = vld [vmem:[%s295_s3] sm:$0xff]  }
   0x4   :  { %v189_v13 = vld [vmem:[%s296_s2] ss:$0 sm:$0xff]  ;;  %v198_v14 = vunpack.c.l.bf16 %v197_v12  ;;  %v199_v17 = vunpack.c.h.bf16 %v197_v12 }
   0x5   :  { %v190_v41 = vld [vmem:[%s297_s4] ss:$0 sm:$0xff] }
   0x6   :  { %206 = vmatpush3.bf16.msra.mxu0 %v214_v2  ;;  %v191_v43 = vld [vmem:[%s298_s5] ss:$0 sm:$0xff] }
   0x8   :  { %v31_v4 = vld [vmem:[#allocation2] sm:$0xff]  ;;  %v32_v6 = vld [vmem:[#allocation2 + $0x8] sm:$0xff] }
   0x9   :  { %208 = vmatmul.mubr.msk.bf16.vlgmr.msra.gmra.mrb[0].mxu0 %vm28_vm0, %v215_v3 }
  0xdc   :  { %v94_v5 = vpop.f32.mrb[0].mxu0 }
  0xdd   :  { %v101_v7 = vadd.f32 %v94_v5, %v31_v4  ;;  %v209_v8 = vpop.f32.mrb[1].mxu0 }
  0xde   :  { %v97_v9 = vpop.f32.mrb[2].mxu0 }
  0xdf   :  { %103 = vst.msk [vmem:[#allocation2] sm:$0xff] %vm28_vm0, %v101_v7  ;;  %v102_v10 = vadd.f32 %v97_v9, %v32_v6  ;;  %v210_v11 = vpop.f32.mrb[3].mxu0 }
  0xe1   :  { %104 = vst.msk [vmem:[#allocation2 + $0x8] sm:$0xff] %vm28_vm0, %v102_v10 }
  0xe6   :  { %v108_v15 = vld [vmem:[#allocation2] sm:$0xff] }
  0xe7   :  { %v117_v16 = vadd.f32 %v189_v13, %v108_v15 }
  0xe8   :  { %v109_v18 = vld [vmem:[#allocation2 + $0x8] sm:$0xff] }
  0xe9   :  { %v123_v19 = vadd.f32 %v198_v14, %v117_v16  ;;  %v118_v20 = vadd.f32 %v189_v13, %v109_v18 }
  0xeb   :  { %v125_v21 = vsel %vm28_vm0, %v123_v19, 0.0  ;;  %v124_v22 = vadd.f32 %v199_v17, %v118_v20 }
  0xec   :  { %126 = vadd.xlane.f32.xlu0 %v125_v21 }
  0xed   :  { %v128_v23 = vsel %vm28_vm0, %v124_v22, 0.0 }
  0xf0   :  { %129 = vadd.xlane.f32.xlu0 %v128_v23 }
 0x179   :  { %v127_v24 = vpop.xlane.xlu0 %126 }
 0x17a   :  { %v132_v25 = vmul.f32 0.03125, %v127_v24 }
 0x17c   :  { %v134_v26 = vsub.f32 %v123_v19, %v132_v25 }
 0x17d   :  { %v130_v27 = vpop.xlane.xlu0 %129 }
 0x17e   :  { %v133_v28 = vmul.f32 0.03125, %v130_v27  ;;  %v136_v29 = vmul.f32 %v134_v26, %v134_v26 }
 0x180   :  { %v135_v30 = vsub.f32 %v124_v22, %v133_v28  ;;  %v138_v31 = vsel %vm28_vm0, %v136_v29, 0.0 }
 0x181   :  { %139 = vadd.xlane.f32.xlu1 %v138_v31 }
 0x182   :  { %v137_v32 = vmul.f32 %v135_v30, %v135_v30 }
 0x184   :  { %v141_v33 = vsel %vm28_vm0, %v137_v32, 0.0 }
 0x185   :  { %142 = vadd.xlane.f32.xlu1 %v141_v33 }
 0x20e   :  { %v140_v34 = vpop.xlane.xlu1 %139 }
 0x20f   :  { %v144_v35 = vmul.f32 0.03125, %v140_v34 }
 0x211   :  { %v146_v36 = vadd.f32 1e-05, %v144_v35 }
 0x212   :  { %v143_v37 = vpop.xlane.xlu1 %142 }
 0x213   :  { %216 = vrsqrt.f32 %v146_v36  ;;  %v145_v38 = vmul.f32 0.03125, %v143_v37 }
 0x215   :  { %v147_v39 = vadd.f32 1e-05, %v145_v38 }
 0x217   :  { %218 = vrsqrt.f32 %v147_v39 }
 0x21d   :  { %v217_v40 = vpop.eup %216 }
 0x21e   :  { %v150_v42 = vmul.f32 %v217_v40, %v134_v26 }
 0x220   :  { %v159_v44 = vmul.f32 %v190_v41, %v150_v42 }
 0x221   :  { %v219_v45 = vpop.eup %218 }
 0x222   :  { %v168_v46 = vadd.f32 %v191_v43, %v159_v44  ;;  %v151_v47 = vmul.f32 %v219_v45, %v135_v30 }
 0x224   :  { %v194_v48 = vpack.c.bf16 %v168_v46, %v168_v46  ;;  %v160_v49 = vmul.f32 %v190_v41, %v151_v47 }
 0x226   :  { %179 = vst.msk [vmem:[%s299_s6] sm:$0xf] %vm178_vm2, %v194_v48  ;;  %v169_v50 = vadd.f32 %v191_v43, %v160_v49 }
 0x228   :  { %v195_v51 = vpack.c.bf16 %v169_v50, %v169_v50 }
 0x22a   :  { %180 = vst.msk [vmem:[%s299_s6 + $0x4] sm:$0xf] %vm178_vm2, %v195_v51 }

// kernel: model_forward.15
= control target key start
LH: loop header
LB: loop body
LE: loop exit
PB: predicated region body
PF: predicated region fallthrough
CT: control target
= control target key end

     0   :  { %vm19_vm0 = vcmask 261120   ;;  %v150_v0 = vmov 0.0   ;;  %vm151_vm1 = vmmov 0   ;;  %vm118_vm2 = vcmask 257024   ;;  %s195_s1 = inlined_call_operand.vmem [shape: bf16[32,32], index: 1, kind: input, shape index: {}]   ;;  %s196_s0 = inlined_call_operand.vmem [shape: bf16[16,32], index: 0, kind: input, shape index: {}]   ;;  %s197_s2 = inlined_call_operand.vmem [shape: f32[1,32], index: 2, kind: input, shape index: {}]   ;;  %s198_s3 = inlined_call_operand.vmem [shape: bf16[16,32], index: 3, kind: output, shape index: {}]  }
   0x1   :  { %137 = vmatprep.subr.bf16.mxu0 %v150_v0  ;;  %v147_v1 = vld [vmem:[%s195_s1] sm:$0xff]   ;;  %141 = vmatprep.mubr.msk.bf16.mxu0 %vm151_vm1, %v150_v0  ;;  %20 = vst.msk [vmem:[#allocation2] sm:$0xff] %vm19_vm0, %v150_v0  ;;  %21 = vst.msk [vmem:[#allocation2 + $0x8] sm:$0xff] %vm19_vm0, %v150_v0  ;;  %v148_v2 = vld [vmem:[%s195_s1 + $0x8] sm:$0xff]  }
   0x2   :  { %138 = vmatpush3.bf16.msra.mxu0 %v147_v1  ;;  %v149_v3 = vld [vmem:[%s196_s0] sm:$0xff]  }
   0x3   :  { %139 = vmatprep.subr.bf16.mxu0 %v150_v0  ;;  %v129_v12 = vld [vmem:[%s197_s2] ss:$0 sm:$0xff] }
   0x6   :  { %140 = vmatpush3.bf16.msra.mxu0 %v148_v2 }
   0x8   :  { %v22_v4 = vld [vmem:[#allocation2] sm:$0xff]  ;;  %v23_v6 = vld [vmem:[#allocation2 + $0x8] sm:$0xff] }
   0x9   :  { %142 = vmatmul.mubr.msk.bf16.vlgmr.msra.gmra.mrb[0].mxu0 %vm19_vm0, %v149_v3 }
  0xdc   :  { %v85_v5 = vpop.f32.mrb[0].mxu0 }
  0xdd   :  { %v92_v7 = vadd.f32 %v85_v5, %v22_v4  ;;  %v143_v8 = vpop.f32.mrb[1].mxu0 }
  0xde   :  { %v88_v9 = vpop.f32.mrb[2].mxu0 }
  0xdf   :  { %94 = vst.msk [vmem:[#allocation2] sm:$0xff] %vm19_vm0, %v92_v7  ;;  %v93_v10 = vadd.f32 %v88_v9, %v23_v6  ;;  %v144_v11 = vpop.f32.mrb[3].mxu0 }
  0xe1   :  { %95 = vst.msk [vmem:[#allocation2 + $0x8] sm:$0xff] %vm19_vm0, %v93_v10 }
  0xe6   :  { %v99_v13 = vld [vmem:[#allocation2] sm:$0xff] }
  0xe7   :  { %v108_v14 = vadd.f32 %v129_v12, %v99_v13 }
  0xe8   :  { %v100_v15 = vld [vmem:[#allocation2 + $0x8] sm:$0xff] }
  0xe9   :  { %v132_v16 = vpack.c.bf16 %v108_v14, %v108_v14  ;;  %v109_v17 = vadd.f32 %v129_v12, %v100_v15 }
  0xeb   :  { %119 = vst.msk [vmem:[%s198_s3] sm:$0xf] %vm118_vm2, %v132_v16  ;;  %v133_v18 = vpack.c.bf16 %v109_v17, %v109_v17 }
  0xed   :  { %120 = vst.msk [vmem:[%s198_s3 + $0x4] sm:$0xf] %vm118_vm2, %v133_v18 }

// kernel: model_forward.18
= control target key start
LH: loop header
LB: loop body
LE: loop exit
PB: predicated region body
PF: predicated region fallthrough
CT: control target
= control target key end

     0   :  { %s1218_s12 = smov 0   ;;  %s1220_s13 = smov 0   ;;  %s1419_s0 = inlined_call_operand.vmem [shape: bf16[2,8,32], index: 0, kind: input, shape index: {}]   ;;  %s1420_s1 = inlined_call_operand.vmem [shape: bf16[2,8,32], index: 1, kind: input, shape index: {}]   ;;  %s1421_s2 = inlined_call_operand.vmem [shape: bf16[2,8,32], index: 2, kind: input, shape index: {}]   ;;  %s1422_s3 = inlined_call_operand.vmem [shape: bf16[2,8,32], index: 3, kind: output, shape index: {}]  }
   0x1   :  { %s1222_s14 = smov 0  }
   0x2 LB: > { %s32_s15 = sadd.s32 1, %s1179_s13  ;;  %p1009_p0 = scmp.ge.s32.totalorder %s1183_s14, 1  ;;  %s1183_s14 = sphi %s1222_s14, %s13_s14   ;;  %s1179_s13 = sphi %s1220_s13, %s1424_s13   ;;  %s1175_s12 = sphi %s1218_s12, %s1423_s12  }
   0x3   : > { %p34_p1 = scmp.ge.s32.totalorder %s32_s15, 2  ;;  %p190_p2 = scmp.lt.s32.totalorder %s1183_s14, 3 }
   0x5   : > { %s1426_s15 = smov (%p34_p1, %s32_s15), 0  ;;  %p191_p3 = pnand %p1009_p0, %p190_p2 }
   0x6   : > { %p232_p4 = scmp.lt.s32.totalorder (!%p191_p3), %s1175_s12, 1  ;;  %v1185_v0 = vmov (!%p191_p3), 0.0   ;;  %vm1186_vm0 = vmmov (!%p191_p3), 0   ;;  %vm291_vm1 = vcmask (!%p191_p3), 64512   ;;  %vm266_vm2 = vcmask (!%p191_p3), 31744   ;;  %s1189_s23 = smov (!%p191_p3), 120  }
   0x7   : > { %194 = sbr.rel (%p191_p3) target bundleno = 1417 (0x589), region = 32  ;;  %1043 = vmatprep.subr.bf16.mxu0 (!%p191_p3), %v1185_v0  ;;  %1045 = vmatprep.mubr.msk.bf16.mxu0 (!%p191_p3), %vm1186_vm0, %v1185_v0  ;;  %v1187_v5 = vmov (!%p191_p3), -inf   ;;  %268 = vst.msk [vmem:[#allocation3] sm:$0xff] (!%p191_p3), %vm266_vm2, %v1185_v0  ;;  %v282_v6 = vlaneseq (!%p191_p3)  ;;  %v1188_v15 = vmov (!%p191_p3), 0   ;;  %s1190_s24 = smov (!%p191_p3), 112   ;;  %vm361_vm4 = vcmask (!%p191_p3), 7168  }
   0x8   : > { %1049 = vmatprep.subr.bf16.mxu1 (!%p191_p3), %v1185_v0  ;;  %1051 = vmatprep.mubr.msk.bf16.mxu1 (!%p191_p3), %vm1186_vm0, %v1185_v0  ;;  %267 = vst.msk [vmem:[#allocation2] sm:$0xff] (!%p191_p3), %vm266_vm2, %v1187_v5  ;;  %s1191_s25 = smov (!%p191_p3), 104   ;;  %vm374_vm5 = vcmask (!%p191_p3), 1043456   ;;  %v1192_v59 = vmov (!%p191_p3), 1   ;;  %v1193_v61 = vmov (!%p191_p3), 2   ;;  %vm500_vm6 = vcmask (!%p191_p3), 15368  }
   0x9   : > { %v1258_v7 = vshrl.u32 (!%p191_p3), %v282_v6, 7  ;;  %v1260_v8 = vand.u32 (!%p191_p3), 127, %v282_v6  ;;  %1128 = vset.pattern.permute.xlu0 (!%p191_p3), %v1188_v15  ;;  %1129 = vset.pattern.permute.xlu1 (!%p191_p3), %v1192_v59  ;;  %v1194_v5 = vmov (!%p191_p3), 3   ;;  %vm269_vm7 = vcmask (!%p191_p3), 261120   ;;  %s1195_s29 = smov (!%p191_p3), 8   ;;  %s1196_s30 = smov (!%p191_p3), 16  }
   0xa   : > { %vm642_vm8 = vcmask (!%p191_p3), 23568   ;;  %270 = vst.msk [vmem:[#allocation4] sm:$0xff] (!%p191_p3), %vm269_vm7, %v1185_v0  ;;  %vm781_vm9 = vcmask (!%p191_p3), 31768   ;;  %s1197_s4 = smov (!%p191_p3), 24   ;;  %vm566_vm10 = vcmask (!%p191_p3), 130112   ;;  %vm705_vm11 = vcmask (!%p191_p3), 195712  }
   0xb   : > { %vm290_vm3 = vcmp.le.s32.totalorder (!%p191_p3), %v1260_v8, %v1258_v7  ;;  %vm844_vm12 = vcmask (!%p191_p3), 261312   ;;  %vm860_vm13 = vcmask (!%p191_p3), 60416   ;;  %vm872_vm14 = vcmask (!%p191_p3), 126016  }
   0xc   : > { %vm884_vm15 = vcmask (!%p191_p3), 191616  }
   0xe   : > { %s1428_s12 = smov (!%p232_p4, %s1175_s12), 1 }
   0xf   : > { %s1242_s16 = sshll.u32 %s1428_s12, 2  ;;  %v1275_v18 = vld [vmem:[#allocation2] sm:$0xff] }
  0x10   : > { %s245_s19 = scalar_lea.vmem %s1420_s1, %s1242_s16  ;;  %s238_s22 = scalar_lea.vmem %s1419_s0, %s1242_s16 }
  0x11   : > { %v280_v1 = vld [vmem:[%s245_s19] sm:$0xf]  ;;  %s252_s28 = scalar_lea.vmem %s1421_s2, %s1242_s16  ;;  %s259_s7 = scalar_lea.vmem %s1422_s3, %s1242_s16 }
  0x12   : > { %v296_v2 = vsel %vm291_vm1, %v280_v1, 0  ;;  %v278_v3 = vld [vmem:[%s238_s22] sm:$0xf]  ;;  %v1017_v16 = vcombine.low %v280_v1, %v280_v1 }
  0x13   : > { %1044 = vmatpush3.bf16.xpose.msra.mxu0 %v296_v2  ;;  %v279_v4 = vmul.bf16 1052065461, %v278_v3  ;;  %v1289_v22 = vld [vmem:[%s252_s28] sm:$0xf] }
  0x14   : > { %1061 = vmatprep.subr.bf16.mxu0 %v1185_v0  ;;  %429 = vrot.lane.b32.xlu1 %v1017_v16, %s1189_s23  ;;  %v376_v23 = vsel %vm374_vm5, %v1289_v22, 0  ;;  %v1019_v3 = vcombine.low %v1289_v22, %v1289_v22 }
  0x15   : > { %v1016_v17 = vcombine.low %v279_v4, %v279_v4  ;;  %1050 = vmatpush3.bf16.msra.mxu1 %v376_v23 }
  0x16   : > { %1055 = vmatprep.subr.bf16.mxu1 %v1185_v0 }
  0x18   : > { %424 = vrot.lane.b32.xlu1 %v1016_v17, %s1189_s23 }
  0x1a   : > { %1046 = vmatmul.mubr.msk.bf16.vlgmr.msra.gmra.mrb[0].mxu0 %vm291_vm1, %v279_v4 }
  0x1b   : > { %1063 = vmatprep.mubr.msk.bf16.mxu0 %vm1186_vm0, %v1185_v0 }
  0x1c   : > { %571 = vrot.lane.b32.xlu1 %v1017_v16, %s1190_s24 }
  0x20   : > { %569 = vrot.lane.b32.xlu1 %v1016_v17, %s1190_s24 }
  0x24   : > { %710 = vrot.lane.b32.xlu1 %v1017_v16, %s1191_s25 }
  0x28   : > { %708 = vrot.lane.b32.xlu1 %v1016_v17, %s1191_s25 }
  0x86   : > { %v430_v27 = vpop.permute.xlu1 %429 }
  0x87   : > { %v435_v30 = vsel %vm291_vm1, %v430_v27, 0  ;;  %v363_v27 = vld [vmem:[#allocation4] sm:$0xff] }
  0x8a   : > { %v425_v28 = vpop.permute.xlu1 %424 }
  0x8e   : > { %v572_v32 = vpop.permute.xlu1 %571 }
  0x8f   : > { %v577_v34 = vsel %vm291_vm1, %v572_v32, 0 }
  0x92   : > { %v570_v33 = vpop.permute.xlu1 %569 }
  0x96   : > { %v711_v35 = vpop.permute.xlu1 %710 }
  0x97   : > { %v716_v36 = vsel %vm291_vm1, %v711_v35, 0 }
  0x9a   : > { %v709_v37 = vpop.permute.xlu1 %708 }
  0xed   : > { %v332_v9 = vpop.f32.mrb[0].mxu0 }
  0xee   : > { %v338_v10 = vsel %vm290_vm3, %v332_v9, -1e+30  ;;  %v1047_v11 = vpop.f32.mrb[1].mxu0 }
  0xef   : > { %v335_v12 = vpop.f32.mrb[2].mxu0  ;;  %v340_v13 = vsel %vm291_vm1, %v338_v10, -inf }
  0xf0   : > { %341 = vmax.xlane.f32.xlu0 %v340_v13  ;;  %v1048_v14 = vpop.f32.mrb[3].mxu0 }
 0x17d   : > { %v342_v19 = vpop.xlane.xlu0 %341 }
 0x17e   : > { %v1278_v20 = vmax.f32 %v1275_v18, %v342_v19 }
 0x180   : > { %v344_v21 = vsub.f32 %v1275_v18, %v1278_v20  ;;  %420 = vst.msk [vmem:[#allocation2] sm:$0xff] %vm361_vm4, %v1278_v20  ;;  %349 = vperm.xlu0 %1128, %v1278_v20  }
 0x182   : > { %v345_v2 = vmul.f32 1.442695, %v344_v21 }
 0x184   : > { %1130 = vset.pattern.permute.xlu0 %v1193_v61 }
 0x187   : > { %v478_v63 = vld [vmem:[#allocation2] sm:$0xff] }
 0x1ff   : > { %v350_v24 = vpop.permute.xlu0 %349 }
 0x200   : > { %v352_v25 = vsub.f32 %v338_v10, %v350_v24 }
 0x202   : > { %v353_v26 = vmul.f32 1.442695, %v352_v25 }
 0x204   : > { %1143 = vpow2.f32 %v353_v26 }
 0x205   : > { %1145 = vpow2.f32 %v345_v2 }
 0x20e   : > { %v1294_v29 = vpop.eup %1143 }
 0x20f   : > { %v370_v31 = vpack.c.bf16 %v1294_v29, %v1294_v29  ;;  %v1352_v10 = vpop.eup %1145  ;;  %v357_v16 = vsel %vm291_vm1, %v1294_v29, 0.0 }
 0x211   : > { %1052 = vmatmul.mubr.msk.bf16.vlgmr.msra.gmra.mrb[0].mxu1 %vm291_vm1, %v370_v31 }
 0x212   : > { %1056 = vmatpush3.bf16.xpose.msra.mxu1 %v435_v30  ;;  %1057 = vmatprep.mubr.msk.bf16.mxu1 %vm1186_vm0, %v1185_v0 }
 0x213   : > { %1067 = vmatprep.subr.bf16.mxu1 %v1185_v0 }
 0x219   : > { %1058 = vmatmul.mubr.msk.bf16.vlgmr.msra.gmra.mrb[4].mxu1 %vm291_vm1, %v425_v28 }
 0x21a   : > { %1068 = vmatpush3.bf16.xpose.msra.mxu1 %v577_v34  ;;  %1069 = vmatprep.mubr.msk.bf16.mxu1 %vm1186_vm0, %v1185_v0 }
 0x21b   : > { %1079 = vmatprep.subr.bf16.mxu1 %v1185_v0 }
 0x221   : > { %1070 = vmatmul.mubr.msk.bf16.vlgmr.msra.gmra.mrb[8].mxu1 %vm291_vm1, %v570_v33 }
 0x222   : > { %1080 = vmatpush3.bf16.xpose.msra.mxu1 %v716_v36  ;;  %1081 = vmatprep.mubr.msk.bf16.mxu1 %vm1186_vm0, %v1185_v0 }
 0x229   : > { %1082 = vmatmul.mubr.msk.bf16.vlgmr.msra.gmra.mrb[12].mxu1 %vm291_vm1, %v709_v37 }
 0x2e4   : > { %v1313_v38 = vpop.f32.mrb[0].mxu1 }
 0x2e5   : > { %v1053_v39 = vpop.f32.mrb[1].mxu1 }
 0x2e6   : > { %v415_v40 = vpop.f32.mrb[2].mxu1 }
 0x2e7   : > { %v1054_v41 = vpop.f32.mrb[3].mxu1 }
 0x2ec   : > { %v471_v42 = vpop.f32.mrb[4].mxu1 }
 0x2ed   : > { %v1318_v43 = vsel %vm290_vm3, %v471_v42, -1e+30  ;;  %v1059_v44 = vpop.f32.mrb[5].mxu1 }
 0x2ee   : > { %v474_v45 = vpop.f32.mrb[6].mxu1  ;;  %v479_v46 = vsel %vm291_vm1, %v1318_v43, -inf }
 0x2ef   : > { %480 = vmax.xlane.f32.xlu1 %v479_v46  ;;  %v1060_v47 = vpop.f32.mrb[7].mxu1 }
 0x2f4   : > { %v613_v48 = vpop.f32.mrb[8].mxu1 }
 0x2f5   : > { %v1325_v49 = vsel %vm290_vm3, %v613_v48, -1e+30  ;;  %v1071_v50 = vpop.f32.mrb[9].mxu1 }
 0x2f6   : > { %v616_v51 = vpop.f32.mrb[10].mxu1  ;;  %v621_v52 = vsel %vm291_vm1, %v1325_v49, -inf }
 0x2f7   : > { %622 = vmax.xlane.f32.xlu0 %v621_v52  ;;  %v1072_v53 = vpop.f32.mrb[11].mxu1 }
 0x2fc   : > { %v752_v54 = vpop.f32.mrb[12].mxu1 }
 0x2fd   : > { %v1332_v55 = vsel %vm290_vm3, %v752_v54, -1e+30  ;;  %v1083_v56 = vpop.f32.mrb[13].mxu1 }
 0x2fe   : > { %v755_v57 = vpop.f32.mrb[14].mxu1  ;;  %v760_v58 = vsel %vm291_vm1, %v1332_v55, -inf }
 0x2ff   : > { %v1084_v60 = vpop.f32.mrb[15].mxu1  ;;  %761 = vmax.xlane.f32.xlu1 %v760_v58 }
 0x37c   : > { %v481_v62 = vpop.xlane.xlu1 %480 }
 0x37d   : > { %v482_v1 = vmax.f32 %v478_v63, %v481_v62 }
 0x37f   : > { %v483_v4 = vsub.f32 %v478_v63, %v482_v1  ;;  %568 = vst.msk [vmem:[#allocation2] sm:$0xff] %vm500_vm6, %v482_v1  ;;  %488 = vperm.xlu1 %1129, %v482_v1  }
 0x381   : > { %v484_v17 = vmul.f32 1.442695, %v483_v4 }
 0x383   : > { %513 = vrot.lane.b32.xlu1 %v1019_v3, %s1189_s23  ;;  %1147 = vpow2.f32 %v484_v17 }
 0x384   : > { %1131 = vset.pattern.permute.xlu1 %v1194_v5  ;;  %v623_v6 = vpop.xlane.xlu0 %622 }
 0x386   : > { %v1346_v7 = vld [vmem:[#allocation2] sm:$0xff] }
 0x387   : > { %v624_v8 = vmax.f32 %v1346_v7, %v623_v6 }
 0x389   : > { %v625_v9 = vsub.f32 %v1346_v7, %v624_v8  ;;  %707 = vst.msk [vmem:[#allocation2] sm:$0xff] %vm642_vm8, %v624_v8  ;;  %630 = vperm.xlu0 %1130, %v624_v8  }
 0x38c   : > { %v762_v11 = vpop.xlane.xlu1 %761 }
 0x38d   : > { %1132 = vset.pattern.permute.xlu0 %v1188_v15  ;;  %v1148_v18 = vpop.eup %1147 }
 0x38e   : > { %366 = vperm.xlu0 %1132, %v1352_v10  }
 0x390   : > { %v1356_v12 = vld [vmem:[#allocation2] sm:$0xff] }
 0x391   : > { %v1359_v13 = vmax.f32 %v1356_v12, %v762_v11 }
 0x392   : > { %1135 = vset.pattern.permute.xlu0 %v1194_v5 }
 0x393   : > { %v764_v14 = vsub.f32 %v1356_v12, %v1359_v13  ;;  %846 = vst.msk [vmem:[#allocation2] sm:$0xff] %vm781_vm9, %v1359_v13  ;;  %769 = vperm.xlu1 %1131, %v1359_v13  }
 0x395   : > { %v765_v56 = vmul.f32 1.442695, %v764_v14 }
 0x397   : > { %652 = vrot.lane.b32.xlu1 %v1019_v3, %s1190_s24 }
 0x398   : > { %1133 = vset.pattern.permute.xlu1 %v1192_v59 }
 0x39b   : > { %791 = vrot.lane.b32.xlu1 %v1019_v3, %s1191_s25 }
 0x3bf   : > { %358 = vadd.xlane.f32.xlu1 %v357_v16 }
 0x3d0   : > { %505 = vperm.xlu1 %1133, %v1148_v18  }
 0x3d4   : > { %1134 = vset.pattern.permute.xlu1 %v1193_v61 }
 0x3fe   : > { %v489_v19 = vpop.permute.xlu1 %488 }
 0x3ff   : > { %v491_v20 = vsub.f32 %v1318_v43, %v489_v19  ;;  %v626_v43 = vmul.f32 1.442695, %v625_v9 }
 0x401   : > { %v492_v21 = vmul.f32 1.442695, %v491_v20 }
 0x402   : > { %v514_v22 = vpop.permute.xlu1 %513 }
 0x403   : > { %1149 = vpow2.f32 %v492_v21  ;;  %v519_v23 = vsel %vm374_vm5, %v514_v22, 0 }
 0x404   : > { %1062 = vmatpush3.bf16.msra.mxu0 %v519_v23 }
 0x405   : > { %1073 = vmatprep.subr.bf16.mxu0 %v1185_v0 }
 0x408   : > { %v631_v24 = vpop.permute.xlu0 %630 }
 0x409   : > { %v633_v25 = vsub.f32 %v1325_v49, %v631_v24  ;;  %v355_v49 = vld [vmem:[#allocation3] sm:$0xff] }
 0x40a   : > { %v356_v50 = vmul.f32 %v1352_v10, %v355_v49 }
 0x40b   : > { %v634_v26 = vmul.f32 1.442695, %v633_v25 }
 0x40d   : > { %v1150_v28 = vpop.eup %1149  ;;  %1151 = vpow2.f32 %v634_v26  ;;  %v367_v29 = vpop.permute.xlu0 %366 }
 0x40e   : > { %v369_v30 = vmul.f32 %v367_v29, %v363_v27  ;;  %v496_v31 = vsel %vm291_vm1, %v1150_v28, 0.0  ;;  %v509_v32 = vpack.c.bf16 %v1150_v28, %v1150_v28 }
 0x40f   : > { %497 = vadd.xlane.f32.xlu0 %v496_v31 }
 0x410   : > { %v418_v33 = vadd.f32 %v1313_v38, %v369_v30  ;;  %1064 = vmatmul.mubr.msk.bf16.vlgmr.msra.gmra.mrb[4].mxu0 %vm291_vm1, %v509_v32 }
 0x411   : > { %1075 = vmatprep.mubr.msk.bf16.mxu0 %vm1186_vm0, %v1185_v0 }
 0x412   : > { %419 = vst.msk [vmem:[#allocation4] sm:$0xff] %vm291_vm1, %v418_v33  ;;  %v770_v34 = vpop.permute.xlu1 %769 }
 0x413   : > { %v772_v35 = vsub.f32 %v1332_v55, %v770_v34 }
 0x415   : > { %v773_v36 = vmul.f32 1.442695, %v772_v35 }
 0x416   : > { %v653_v37 = vpop.permute.xlu1 %652 }
 0x417   : > { %v1152_v39 = vpop.eup %1151  ;;  %1153 = vpow2.f32 %v773_v36  ;;  %v658_v40 = vsel %vm374_vm5, %v653_v37, 0 }
 0x418   : > { %1074 = vmatpush3.bf16.msra.mxu0 %v658_v40  ;;  %v638_v41 = vsel %vm291_vm1, %v1152_v39, 0.0  ;;  %v651_v38 = vpack.c.bf16 %v1152_v39, %v1152_v39  ;;  %1155 = vpow2.f32 %v626_v43 }
 0x419   : > { %639 = vadd.xlane.f32.xlu1 %v638_v41  ;;  %1085 = vmatprep.subr.bf16.mxu0 %v1185_v0  ;;  %1157 = vpow2.f32 %v765_v56  ;;  %v502_v20 = vld [vmem:[#allocation4] sm:$0xff] }
 0x41a   : > { %v792_v42 = vpop.permute.xlu1 %791 }
 0x41b   : > { %1076 = vmatmul.mubr.msk.bf16.vlgmr.msra.gmra.mrb[8].mxu0 %vm291_vm1, %v651_v38  ;;  %v797_v44 = vsel %vm374_vm5, %v792_v42, 0 }
 0x41c   : > { %1086 = vmatpush3.bf16.msra.mxu0 %v797_v44  ;;  %1087 = vmatprep.mubr.msk.bf16.mxu0 %vm1186_vm0, %v1185_v0  ;;  %vm896_vm0 = vcmask 257216  }
 0x421   : > { %v1154_v45 = vpop.eup %1153 }
 0x422   : > { %v777_v46 = vsel %vm291_vm1, %v1154_v45, 0.0  ;;  %v790_v47 = vpack.c.bf16 %v1154_v45, %v1154_v45  ;;  %v1156_v48 = vpop.eup %1155 }
 0x423   : > { %778 = vadd.xlane.f32.xlu0 %v777_v46  ;;  %v1158_v63 = vpop.eup %1157 }
 0x424   : > { %1088 = vmatmul.mubr.msk.bf16.vlgmr.msra.gmra.mrb[12].mxu0 %vm291_vm1, %v790_v47 }
 0x42a   : > { %647 = vperm.xlu1 %1134, %v1156_v48  }
 0x42e   : > { %1136 = vset.pattern.permute.xlu1 %v1188_v15 }
 0x44c   : > { %v359_v51 = vpop.xlane.xlu1 %358 }
 0x44d   : > { %v360_v52 = vadd.f32 %v359_v51, %v356_v50 }
 0x44f   : > { %362 = vst.msk [vmem:[#allocation3] sm:$0xff] %vm361_vm4, %v360_v52 }
 0x450   : > { %v506_v57 = vpop.permute.xlu1 %505 }
 0x451   : > { %v508_v21 = vmul.f32 %v506_v57, %v502_v20 }
 0x456   : > { %v494_v0 = vld [vmem:[#allocation3] sm:$0xff] }
 0x457   : > { %v495_v53 = vmul.f32 %v1148_v18, %v494_v0 }
 0x49c   : > { %v498_v54 = vpop.xlane.xlu0 %497 }
 0x49d   : > { %v499_v55 = vadd.f32 %v498_v54, %v495_v53 }
 0x49f   : > { %501 = vst.msk [vmem:[#allocation3] sm:$0xff] %vm500_vm6, %v499_v55 }
 0x4a6   : > { %v636_v58 = vld [vmem:[#allocation3] sm:$0xff]  ;;  %v640_v60 = vpop.xlane.xlu1 %639 }
 0x4a7   : > { %v637_v15 = vmul.f32 %v1156_v48, %v636_v58 }
 0x4a9   : > { %v641_v62 = vadd.f32 %v640_v60, %v637_v15 }
 0x4aa   : > { %v648_v24 = vpop.permute.xlu1 %647 }
 0x4ab   : > { %643 = vst.msk [vmem:[#allocation3] sm:$0xff] %vm642_vm8, %v641_v62 }
 0x4b0   : > { %v779_v3 = vpop.xlane.xlu0 %778 }
 0x4b2   : > { %v775_v1 = vld [vmem:[#allocation3] sm:$0xff] }
 0x4b3   : > { %v776_v2 = vmul.f32 %v1158_v63, %v775_v1 }
 0x4b5   : > { %v780_v4 = vadd.f32 %v779_v3, %v776_v2 }
 0x4b7   : > { %782 = vst.msk [vmem:[#allocation3] sm:$0xff] %vm781_vm9, %v780_v4 }
 0x4be   : > { %v850_v6 = vld [vmem:[#allocation3] sm:$0xff] }
 0x4bf   : > { %1159 = vrcp.f32 %v850_v6 }
 0x4c9   : > { %v1160_v7 = vpop.eup %1159 }
 0x4ca   : > { %855 = vperm.xlu1 %1136, %v1160_v7  }
 0x4ce   : > { %1138 = vset.pattern.permute.xlu1 %v1193_v61 }
 0x4cf   : > { %879 = vperm.xlu1 %1138, %v1160_v7  }
 0x4d3   : > { %1139 = vset.pattern.permute.xlu1 %v1194_v5 }
 0x4d4   : > { %891 = vperm.xlu1 %1139, %v1160_v7  }
 0x4e3   : > { %v555_v8 = vpop.f32.mrb[4].mxu0 }
 0x4e4   : > { %562 = vrot.lane.b32.xlu0 %v555_v8, %s1195_s29  ;;  %v1065_v9 = vpop.f32.mrb[5].mxu0 }
 0x4e5   : > { %v558_v10 = vpop.f32.mrb[6].mxu0 }
 0x4e6   : > { %v1066_v11 = vpop.f32.mrb[7].mxu0 }
 0x4ee   : > { %v694_v12 = vpop.f32.mrb[8].mxu0 }
 0x4ef   : > { %701 = vrot.lane.b32.xlu0 %v694_v12, %s1196_s30  ;;  %v1077_v13 = vpop.f32.mrb[9].mxu0 }
 0x4f0   : > { %v697_v14 = vpop.f32.mrb[10].mxu0 }
 0x4f1   : > { %v1078_v16 = vpop.f32.mrb[11].mxu0 }
 0x4f3   : > { %786 = vperm.xlu0 %1135, %v1158_v63  }
 0x4f7   : > { %v833_v17 = vpop.f32.mrb[12].mxu0  ;;  %1137 = vset.pattern.permute.xlu0 %v1192_v59 }
 0x4f8   : > { %840 = vrot.lane.b32.xlu0 %v833_v17, %s1197_s4  ;;  %v1089_v61 = vpop.f32.mrb[13].mxu0 }
 0x4f9   : > { %v836_v18 = vpop.f32.mrb[14].mxu0 }
 0x4fa   : > { %v1090_v19 = vpop.f32.mrb[15].mxu0 }
 0x4fc   : > { %867 = vperm.xlu0 %1137, %v1160_v7  }
 0x500   : > { %1140 = vset.pattern.permute.xlu0 %v1194_v5 }
 0x549   : > { %v856_v30 = vpop.permute.xlu1 %855 }
 0x54e   : > { %v880_v33 = vpop.permute.xlu1 %879 }
 0x553   : > { %v892_v36 = vpop.permute.xlu1 %891 }
 0x556   : > { %v563_v22 = vpop.permute.xlu0 %562 }
 0x557   : > { %v565_v23 = vadd.f32 %v563_v22, %v508_v21 }
 0x559   : > { %567 = vst.msk [vmem:[#allocation4] sm:$0xff] %vm566_vm10, %v565_v23 }
 0x560   : > { %v644_v25 = vld [vmem:[#allocation4] sm:$0xff] }
 0x561   : > { %v650_v26 = vmul.f32 %v648_v24, %v644_v25  ;;  %v702_v27 = vpop.permute.xlu0 %701 }
 0x563   : > { %v704_v59 = vadd.f32 %v702_v27, %v650_v26 }
 0x565   : > { %706 = vst.msk [vmem:[#allocation4] sm:$0xff] %vm705_vm11, %v704_v59 }
 0x56c   : > { %v783_v29 = vld [vmem:[#allocation4] sm:$0xff] }
 0x572   : > { %v787_v28 = vpop.permute.xlu0 %786 }
 0x573   : > { %v789_v31 = vmul.f32 %v787_v28, %v783_v29 }
 0x576   : > { %v841_v5 = vpop.permute.xlu0 %840 }
 0x577   : > { %v843_v32 = vadd.f32 %v841_v5, %v789_v31 }
 0x579   : > { %845 = vst.msk [vmem:[#allocation4] sm:$0xff] %vm844_vm12, %v843_v32 }
 0x57b   : > { %v868_v35 = vpop.permute.xlu0 %867 }
 0x580   : > { %v852_v34 = vld [vmem:[#allocation4] sm:$0xff] }
 0x581   : > { %v858_v37 = vmul.f32 %v856_v30, %v852_v34  ;;  %v882_v39 = vmul.f32 %v880_v33, %v852_v34  ;;  %v870_v40 = vmul.f32 %v868_v35, %v852_v34  ;;  %v894_v41 = vmul.f32 %v892_v36, %v852_v34 }
 0x583   : > { %v859_v38 = vpack.c.bf16 %v858_v37, %v858_v37  ;;  %v871_v42 = vpack.c.bf16 %v870_v40, %v870_v40  ;;  %v883_v43 = vpack.c.bf16 %v882_v39, %v882_v39  ;;  %v895_v44 = vpack.c.bf16 %v894_v41, %v894_v41 }
 0x585   : > { %861 = vst.msk [vmem:[%s259_s7] sm:$0xf] %vm860_vm13, %v859_v38 }
 0x586   : > { %873 = vst.msk [vmem:[%s259_s7] sm:$0xf] %vm872_vm14, %v871_v42 }
 0x587   : > { %885 = vst.msk [vmem:[%s259_s7] sm:$0xf] %vm884_vm15, %v883_v43 }
 0x588   : > { %897 = vst.msk [vmem:[%s259_s7] sm:$0xf] %vm896_vm0, %v895_v44 }
 0x589 PF: > { %s13_s14 = sadd.s32 1, %s1183_s14   ;;  %s1423_s12 = smov %s1179_s13 }
 0x58a   : > { %p10_p5 = scmp.ge.s32.totalorder %s13_s14, 4   ;;  %s1424_s13 = smov %s1426_s15 }
 0x58c   :  { %12 = sbr.rel (!%p10_p5) target bundleno = 2 (0x2), region = 80 }

// kernel: model_forward.20
= control target key start
LH: loop header
LB: loop body
LE: loop exit
PB: predicated region body
PF: predicated region fallthrough
CT: control target
= control target key end

     0   :  { %v167_v0 = vmov 0.0   ;;  %vm168_vm0 = vmmov 0   ;;  %vm46_vm1 = vcmask 261120   ;;  %s204_s1 = inlined_call_operand.vmem [shape: bf16[32,128], index: 1, kind: input, shape index: {}]   ;;  %s205_s0 = inlined_call_operand.vmem [shape: bf16[16,32], index: 0, kind: input, shape index: {}]   ;;  %s206_s2 = inlined_call_operand.vmem [shape: f32[1,128], index: 2, kind: input, shape index: {}]   ;;  %s207_s3 = inlined_call_operand.vmem [shape: bf16[16,128], index: 3, kind: output, shape index: {}]  }
   0x1   :  { %150 = vmatprep.subr.bf16.mxu0 %v167_v0  ;;  %v160_v1 = vld [vmem:[%s204_s1] sm:$0xff]   ;;  %154 = vmatprep.mubr.msk.bf16.mxu0 %vm168_vm0, %v167_v0  ;;  %v161_v2 = vld [vmem:[%s204_s1 + $0x8] sm:$0xff]  }
   0x2   :  { %151 = vmatpush3.bf16.msra.mxu0 %v160_v1  ;;  %v162_v3 = vld [vmem:[%s205_s0] sm:$0xff]  }
   0x3   :  { %152 = vmatprep.subr.bf16.mxu0 %v167_v0  ;;  %v137_v4 = vld [vmem:[%s206_s2] ss:$0 sm:$0xff] }
   0x6   :  { %153 = vmatpush3.bf16.msra.mxu0 %v161_v2 }
   0x9   :  { %155 = vmatmul.mubr.msk.bf16.vlgmr.msra.gmra.mrb[0].mxu0 %vm46_vm1, %v162_v3 }
  0xdc   :  { %v84_v5 = vpop.f32.mrb[0].mxu0 }
  0xdd   :  { %v107_v6 = vadd.f32 %v137_v4, %v84_v5  ;;  %v156_v7 = vpop.f32.mrb[1].mxu0 }
  0xde   :  { %v87_v8 = vpop.f32.mrb[2].mxu0 }
  0xdf   :  { %v111_v9 = vmul.f32 0.70710677, %v107_v6  ;;  %v108_v10 = vadd.f32 %v137_v4, %v87_v8  ;;  %v157_v11 = vpop.f32.mrb[3].mxu0  ;;  %v109_v16 = vmul.f32 0.5, %v107_v6 }
  0xe1   :  { %163 = verf.f32 %v111_v9  ;;  %v112_v12 = vmul.f32 0.70710677, %v108_v10  ;;  %v110_v17 = vmul.f32 0.5, %v108_v10 }
  0xe3   :  { %165 = verf.f32 %v112_v12 }
  0xeb   :  { %v164_v13 = vpop.eup %163 }
  0xec   :  { %v115_v14 = vadd.f32 1.0, %v164_v13 }
  0xed   :  { %v166_v15 = vpop.eup %165 }
  0xee   :  { %v116_v18 = vadd.f32 1.0, %v166_v15  ;;  %v117_v19 = vmul.f32 %v115_v14, %v109_v16 }
  0xf0   :  { %v118_v20 = vmul.f32 %v116_v18, %v110_v17 }
  0xf2   :  { %v145_v21 = vpack.c.bf16 %v118_v20, %v117_v19 }
  0xf4   :  { %146 = vst [vmem:[%s207_s3] sm:$0xff] %v145_v21  }

// kernel: model_forward.21
= control target key start
LH: loop header
LB: loop body
LE: loop exit
PB: predicated region body
PF: predicated region fallthrough
CT: control target
= control target key end

     0   :  { %vm28_vm0 = vcmask 261120   ;;  %v295_v0 = vmov 0.0   ;;  %vm296_vm1 = vmmov 0   ;;  %vm224_vm2 = vcmask 257024   ;;  %s385_s1 = inlined_call_operand.vmem [shape: bf16[128,32], index: 1, kind: input, shape index: {}]   ;;  %s386_s0 = inlined_call_operand.vmem [shape: bf16[16,128], index: 0, kind: input, shape index: {}]   ;;  %s387_s3 = inlined_call_operand.vmem [shape: bf16[16,32], index: 3, kind: input, shape index: {}]   ;;  %s388_s2 = inlined_call_operand.vmem [shape: f32[1,32], index: 2, kind: input, shape index: {}]   ;;  %s389_s4 = inlined_call_operand.vmem [shape: f32[1,32], index: 4, kind: input, shape index: {}]   ;;  %s390_s5 = inlined_call_operand.vmem [shape: f32[1,32], index: 5, kind: input, shape index: {}]   ;;  %s391_s6 = inlined_call_operand.vmem [shape: bf16[16,32], index: 6, kind: output, shape index: {}]  }
   0x1   :  { %260 = vmatprep.subr.bf16.mxu0 %v295_v0  ;;  %v282_v1 = vld [vmem:[%s385_s1] sm:$0xff]   ;;  %276 = vmatprep.mubr.msk.bf16.mxu0 %vm296_vm1, %v295_v0  ;;  %29 = vst.msk [vmem:[#allocation2] sm:$0xff] %vm28_vm0, %v295_v0  ;;  %30 = vst.msk [vmem:[#allocation2 + $0x8] sm:$0xff] %vm28_vm0, %v295_v0  ;;  %v283_v2 = vld [vmem:[%s385_s1 + $0x8] sm:$0xff]  }
   0x2   :  { %261 = vmatpush3.bf16.msra.mxu0 %v282_v1  ;;  %v284_v3 = vld [vmem:[%s385_s1 + $0x10] sm:$0xff]   ;;  %v285_v4 = vld [vmem:[%s385_s1 + $0x18] sm:$0xff]   ;;  %v286_v5 = vld [vmem:[%s385_s1 + $0x20] sm:$0xff]  }
   0x3   :  { %262 = vmatprep.subr.bf16.mxu0 %v295_v0  ;;  %v287_v6 = vld [vmem:[%s385_s1 + $0x28] sm:$0xff]   ;;  %v288_v7 = vld [vmem:[%s385_s1 + $0x30] sm:$0xff]   ;;  %v289_v8 = vld [vmem:[%s385_s1 + $0x38] sm:$0xff]  }
   0x4   :  { %v290_v9 = vld [vmem:[%s386_s0] sm:$0xff]  }
   0x5   :  { %v248_v18 = vld [vmem:[%s387_s3] sm:$0xff]  }
   0x6   :  { %263 = vmatpush3.bf16.msra.mxu0 %v283_v2  ;;  %v240_v19 = vld [vmem:[%s388_s2] ss:$0 sm:$0xff]  ;;  %v249_v20 = vunpack.c.l.bf16 %v248_v18  ;;  %v250_v23 = vunpack.c.h.bf16 %v248_v18 }
   0x7   :  { %264 = vmatprep.subr.bf16.mxu0 %v295_v0  ;;  %v241_v47 = vld [vmem:[%s389_s4] ss:$0 sm:$0xff] }
   0x8   :  { %v31_v10 = vld [vmem:[#allocation2] sm:$0xff]  ;;  %v32_v12 = vld [vmem:[#allocation2 + $0x8] sm:$0xff] }
   0x9   :  { %v242_v49 = vld [vmem:[%s390_s5] ss:$0 sm:$0xff] }
   0xa   :  { %265 = vmatpush3.bf16.msra.mxu0 %v284_v3 }
   0xb   :  { %266 = vmatprep.subr.bf16.mxu0 %v295_v0 }
   0xe   :  { %267 = vmatpush3.bf16.msra.mxu0 %v285_v4 }
   0xf   :  { %268 = vmatprep.subr.bf16.mxu0 %v295_v0 }
  0x12   :  { %269 = vmatpush3.bf16.msra.mxu0 %v286_v5 }
  0x13   :  { %270 = vmatprep.subr.bf16.mxu0 %v295_v0 }
  0x16   :  { %271 = vmatpush3.bf16.msra.mxu0 %v287_v6 }
  0x17   :  { %272 = vmatprep.subr.bf16.mxu0 %v295_v0 }
  0x1a   :  { %273 = vmatpush3.bf16.msra.mxu0 %v288_v7 }
  0x1b   :  { %274 = vmatprep.subr.bf16.mxu0 %v295_v0 }
  0x1e   :  { %275 = vmatpush3.bf16.msra.mxu0 %v289_v8 }
  0x21   :  { %277 = vmatmul.mubr.bf16.vlgmr.msra.gmra.mrb[0].mxu0 %v290_v9 }
  0xf4   :  { %v139_v11 = vpop.f32.mrb[0].mxu0 }
  0xf5   :  { %v146_v13 = vadd.f32 %v139_v11, %v31_v10  ;;  %v278_v14 = vpop.f32.mrb[1].mxu0 }
  0xf6   :  { %v142_v15 = vpop.f32.mrb[2].mxu0 }
  0xf7   :  { %149 = vst.msk [vmem:[#allocation2] sm:$0xff] %vm28_vm0, %v146_v13  ;;  %v147_v16 = vadd.f32 %v142_v15, %v32_v12  ;;  %v279_v17 = vpop.f32.mrb[3].mxu0 }
  0xf9   :  { %150 = vst.msk [vmem:[#allocation2 + $0x8] sm:$0xff] %vm28_vm0, %v147_v16 }
  0xfe   :  { %v154_v21 = vld [vmem:[#allocation2] sm:$0xff] }
  0xff   :  { %v163_v22 = vadd.f32 %v240_v19, %v154_v21 }
 0x100   :  { %v155_v24 = vld [vmem:[#allocation2 + $0x8] sm:$0xff] }
 0x101   :  { %v169_v25 = vadd.f32 %v249_v20, %v163_v22  ;;  %v164_v26 = vadd.f32 %v240_v19, %v155_v24 }
 0x103   :  { %v171_v27 = vsel %vm28_vm0, %v169_v25, 0.0  ;;  %v170_v28 = vadd.f32 %v250_v23, %v164_v26 }
 0x104   :  { %172 = vadd.xlane.f32.xlu0 %v171_v27 }
 0x105   :  { %v174_v29 = vsel %vm28_vm0, %v170_v28, 0.0 }
 0x108   :  { %175 = vadd.xlane.f32.xlu0 %v174_v29 }
 0x191   :  { %v173_v30 = vpop.xlane.xlu0 %172 }
 0x192   :  { %v178_v31 = vmul.f32 0.03125, %v173_v30 }
 0x194   :  { %v180_v32 = vsub.f32 %v169_v25, %v178_v31 }
 0x195   :  { %v176_v33 = vpop.xlane.xlu0 %175 }
 0x196   :  { %v179_v34 = vmul.f32 0.03125, %v176_v33  ;;  %v182_v35 = vmul.f32 %v180_v32, %v180_v32 }
 0x198   :  { %v181_v36 = vsub.f32 %v170_v28, %v179_v34  ;;  %v184_v37 = vsel %vm28_vm0, %v182_v35, 0.0 }
 0x199   :  { %185 = vadd.xlane.f32.xlu1 %v184_v37 }
 0x19a   :  { %v183_v38 = vmul.f32 %v181_v36, %v181_v36 }
 0x19c   :  { %v187_v39 = vsel %vm28_vm0, %v183_v38, 0.0 }
 0x19d   :  { %188 = vadd.xlane.f32.xlu1 %v187_v39 }
 0x226   :  { %v186_v40 = vpop.xlane.xlu1 %185 }
 0x227   :  { %v190_v41 = vmul.f32 0.03125, %v186_v40 }
 0x229   :  { %v192_v42 = vadd.f32 1e-05, %v190_v41 }
 0x22a   :  { %v189_v43 = vpop.xlane.xlu1 %188 }
 0x22b   :  { %291 = vrsqrt.f32 %v192_v42  ;;  %v191_v44 = vmul.f32 0.03125, %v189_v43 }
 0x22d   :  { %v193_v45 = vadd.f32 1e-05, %v191_v44 }
 0x22f   :  { %293 = vrsqrt.f32 %v193_v45 }
 0x235   :  { %v292_v46 = vpop.eup %291 }
 0x236   :  { %v196_v48 = vmul.f32 %v292_v46, %v180_v32 }
 0x238   :  { %v205_v50 = vmul.f32 %v241_v47, %v196_v48 }
 0x239   :  { %v294_v51 = vpop.eup %293 }
 0x23a   :  { %v214_v52 = vadd.f32 %v242_v49, %v205_v50  ;;  %v197_v53 = vmul.f32 %v294_v51, %v181_v36 }
 0x23c   :  { %v245_v54 = vpack.c.bf16 %v214_v52, %v214_v52  ;;  %v206_v55 = vmul.f32 %v241_v47, %v197_v53 }
 0x23e   :  { %225 = vst.msk [vmem:[%s391_s6] sm:$0xf] %vm224_vm2, %v245_v54  ;;  %v215_v56 = vadd.f32 %v242_v49, %v206_v55 }
 0x240   :  { %v246_v57 = vpack.c.bf16 %v215_v56, %v215_v56 }
 0x242   :  { %226 = vst.msk [vmem:[%s391_s6 + $0x4] sm:$0xf] %vm224_vm2, %v246_v57 }

// kernel: model_forward.29
= control target key start
LH: loop header
LB: loop body
LE: loop exit
PB: predicated region body
PF: predicated region fallthrough
CT: control target
= control target key end

     0   :  { %v178_v1 = vmov 0.0   ;;  %vm179_vm0 = vmmov 0   ;;  %vm20_vm1 = vcmask 523264   ;;  %s233_s0 = inlined_call_operand.vmem [shape: bf16[16,32], index: 0, kind: input, shape index: {}]   ;;  %s234_s1 = inlined_call_operand.vmem [shape: bf16[32,64], index: 1, kind: input, shape index: {}]   ;;  %s235_s2 = inlined_call_operand.vmem [shape: f32[1,64], index: 2, kind: input, shape index: {}]   ;;  %s236_s3 = inlined_call_operand.hbm [shape: f32[16,64], index: 3, kind: output, shape index: {}]  }
   0x1   :  { %v151_v0 = vld [vmem:[%s234_s1] sm:$0xff]   ;;  %138 = vmatprep.subr.bf16.mxu0 %v178_v1  ;;  %v152_v2 = vld [vmem:[%s234_s1 + $0x8] sm:$0xff]   ;;  %142 = vmatprep.mubr.msk.bf16.mxu0 %vm179_vm0, %v178_v1 }
   0x2   :  { %139 = vmatpush3.bf16.msra.mxu0 %v151_v0 }
   0x3   :  { %140 = vmatprep.subr.bf16.mxu0 %v178_v1 }
   0x4   :  { %8 = vsyncpa [#allocation3], 0  ;;  %21 = vst.msk [vmem:[#allocation2] sm:$0xff] %vm20_vm1, %v178_v1  ;;  %v153_v3 = vld [vmem:[%s233_s0] sm:$0xff]   ;;  %vm48_vm2 = vcmask 261120   ;;  %s180_s0 = smov [#allocation2]  }
   0x5   :  { %22 = vst.msk [vmem:[#allocation2 + $0x8] sm:$0xff] %vm20_vm1, %v178_v1  ;;  %v134_v12 = vld [vmem:[%s235_s2] ss:$0 sm:$0xff]  ;;  %s119_s19 = sshll.u32 %s180_s0, 4  ;;  %s120_s19 = int_to_ptr.vmem [resolvable:$true] %s119_s19 }
   0x6   :  { %141 = vmatpush3.bf16.msra.mxu0 %v152_v2  ;;  %s154_s20 = scalar_lea.vmem %s120_s19, 256  ;;  %p159_p1 = scmp.lt.s32.totalorder %s120_s19, %s120_s19 }
   0x7   :  { %p155_p0 = scmp.ne.s32.totalorder %s120_s19, %s154_s20  ;;  %p160_p2 = scmp.lt.s32.totalorder %s154_s20, %s154_s20 }
   0x9   :  { %143 = vmatmul.mubr.msk.bf16.vlgmr.msra.gmra.mrb[0].mxu0 %vm48_vm2, %v153_v3  ;;  %p161_p3 = por %p160_p2, %p159_p1 }
   0xb   :  { %v23_v4 = vld [vmem:[#allocation2] sm:$0xff]  ;;  %p162_p4 = pnand %p161_p3, %p155_p0 }
   0xc   :  { %v24_v6 = vld [vmem:[#allocation2 + $0x8] sm:$0xff] }
  0xdc   :  { %v86_v5 = vpop.f32.mrb[0].mxu0 }
  0xdd   :  { %v93_v7 = vadd.f32 %v86_v5, %v23_v4  ;;  %v144_v8 = vpop.f32.mrb[1].mxu0 }
  0xde   :  { %v89_v9 = vpop.f32.mrb[2].mxu0 }
  0xdf   :  { %96 = vst.msk [vmem:[#allocation2] sm:$0xff] %vm20_vm1, %v93_v7  ;;  %v94_v10 = vadd.f32 %v89_v9, %v24_v6  ;;  %v145_v11 = vpop.f32.mrb[3].mxu0 }
  0xe1   :  { %97 = vst.msk [vmem:[#allocation2 + $0x8] sm:$0xff] %vm20_vm1, %v94_v10 }
  0xe6   :  { %v101_v13 = vld [vmem:[#allocation2] sm:$0xff] }
  0xe7   :  { %v110_v14 = vadd.f32 %v134_v12, %v101_v13 }
  0xe8   :  { %v102_v15 = vld [vmem:[#allocation2 + $0x8] sm:$0xff] }
  0xe9   :  { %v111_v16 = vadd.f32 %v134_v12, %v102_v15  ;;  %112 = vst.msk [vmem:[#allocation2] sm:$0xff] %vm20_vm1, %v110_v14 }
  0xeb   :  { %113 = vst.msk [vmem:[#allocation2 + $0x8] sm:$0xff] %vm20_vm1, %v111_v16 }
  0xec   :  { %165 = shalt.err (!%p162_p4)
}
  0xed   :  { %s166_s22 = scalar_lea.hbm %s236_s3, 256 }
  0xee   :  { %p167_p5 = scmp.ne.s32.totalorder %s236_s3, %s166_s22  ;;  %p170_p6 = scmp.lt.u32.totalorder %s166_s22, %s236_s3 }
  0xf0   :  { %p172_p7 = pnand %p170_p6, %p167_p5 }
  0xf2   :  { %175 = shalt.err (!%p172_p7)
}
  0xf3   :  { %s181_s27 = smov 128   ;;  %s182_s28 = smov 8  }
  0xf4   :  { %125 = dma.vmem_to_hbm [thread:$0]  %s120_s19, 256, %s236_s3, [#allocation3], %s181_s27, %s181_s27, %s182_s28  }
  0xf5   :  { %176 = dma.done.wait [#allocation3], 256  }
  0xf6   :  { %177 = vsyncadd [#allocation3], 4294967040 }
  0xf7   :  { %129 = vsyncpa [#allocation3], 1 }

</bundles_post_ra>
